<compile_context>
chip_gen: v7x
topology: tpu7x:2x2x1
jax: 0.10.0
libtpu: 0.0.40
codegen_flags: <defaults>
</compile_context>

<pallas_src>
import jax
import jax.numpy as jnp
from jax.experimental import pallas as pl
from jax.experimental.pallas import tpu as pltpu

KH = KW = 3          # depthwise kernel size
EPS = 1e-5           # BatchNorm2d default eps
LANE = 128           # TPU lane width


@jax.jit
def depthwise_separable_conv(x_nchw, w_dw, w_pw, gamma, beta):
    """x_nchw: (N, Cin, H, W); w_dw: (Cin, 1, 3, 3); w_pw: (Cout, Cin, 1, 1)."""
    N, Cin, H, W = x_nchw.shape
    Cout = w_pw.shape[0]
    assert Cin == Cout, "shared BatchNorm2d requires in_channels == out_channels"
    C = Cin
    f32 = jnp.float32

    Cp = ((C + LANE - 1) // LANE) * LANE      # lane-dense channel padding
    n_cb = Cp // LANE                         # channel blocks of 128 lanes
    Hp = H + 2                                # 1-px zero halo top/bottom
    Wpp = ((W + 2 + 7) // 8) * 8              # halo + pad W to a sublane multiple
    HW = H * W
    HWpp = H * Wpp
    M = N * H * W                             # pixels (BN population size)
    assert HW % 8 == 0

    # Rows per tile for the pixel-matrix kernels (K2/K3).  Use >=512 for real
    # sizes; kept at 128 here so the demo shape still runs a multi-step,
    # double-buffered grid.
    TM = 128 if M % 128 == 0 else HW
    n_tiles = M // TM

    # ---- glue: layout change + zero padding + weight/BN repacking (plain JAX)
    # TODO(synk): the NCHW->NHWC transpose and halo/channel pad could be fused
    # into K1 with masked loads; kept as one transpose + one pad here.
    x_nhwc = jnp.transpose(x_nchw, (0, 2, 3, 1)).astype(f32)
    xp = jnp.pad(x_nhwc, ((0, 0), (1, 1), (1, Wpp - W - 1), (0, Cp - C)))
    xp = xp.reshape(N, Hp * Wpp, Cp)          # rows flattened as (h, w)

    wdw = jnp.transpose(w_dw[:, 0, :, :], (1, 2, 0)).reshape(KH * KW, C)
    wdw = jnp.pad(wdw, ((0, 0), (0, Cp - C))).astype(f32)          # (9, Cp)
    wpw = jnp.pad(jnp.transpose(w_pw[:, :, 0, 0], (1, 0)),
                  ((0, Cp - C), (0, Cp - C))).astype(f32)          # (Cp, Cp)
    g = jnp.pad(gamma.astype(f32), (0, Cp - C))
    b = jnp.pad(beta.astype(f32), (0, Cp - C))

    vmem_cap = 32 * 1024 * 1024
    cparams_1d = pltpu.CompilerParams(
        dimension_semantics=("parallel",), vmem_limit_bytes=vmem_cap)

    # --------------- K1: depthwise 3x3 + BN1 partial statistics --------------
    def dw_kernel(xp_ref, wdw_ref, y_ref, st_ref):
        xflat = xp_ref[0]                     # (Hp*Wpp, LANE) one padded image
        wdw_all = wdw_ref[...]                # all 9 taps, loaded once (hoisted)
        n_rows = xflat.shape[0]
        acc = jnp.zeros((HWpp, LANE), f32)
        for kj in range(KW):                  # W-direction tap offset
            # One XLU sublane rotate per kj (== jnp.roll by -kj).  Wrapped rows
            # only ever land in the discarded right-pad columns (Wpp >= W + 2).
            xsh = xflat if kj == 0 else pltpu.roll(xflat, n_rows - kj, axis=0)
            for ki in range(KH):              # H-direction tap offset
                base = ki * Wpp               # multiple of 8 -> aligned slice
                acc = acc + xsh[base:base + HWpp, :] * wdw_all[ki * KW + kj]
        # Extract the valid (h, w) region; all reshapes/slices are 8-aligned.
        y2 = acc.reshape(H, Wpp, LANE)[:, :W, :].reshape(HW, LANE)
        y_ref[...] = y2                       # lane-dense (HW, 128) store
        s = jnp.sum(y2, axis=0, keepdims=True)
        ss = jnp.sum(y2 * y2, axis=0, keepdims=True)
        st_ref[...] = jnp.concatenate([s, ss], axis=0)[None, None]

    y1, st1 = pl.pallas_call(
        dw_kernel,
        grid=(N, n_cb),
        in_specs=[
            pl.BlockSpec((1, Hp * Wpp, LANE), lambda n, c: (n, 0, c)),
            pl.BlockSpec((KH * KW, LANE), lambda n, c: (0, c)),
        ],
        out_specs=[
            pl.BlockSpec((HW, LANE), lambda n, c: (n, c)),
            pl.BlockSpec((1, 1, 2, LANE), lambda n, c: (n, c, 0, 0)),
        ],
        out_shape=[
            jax.ShapeDtypeStruct((M, Cp), f32),            # depthwise output
            jax.ShapeDtypeStruct((N, n_cb, 2, LANE), f32),  # partial sum/sumsq
        ],
        compiler_params=pltpu.CompilerParams(
            dimension_semantics=("parallel", "parallel"),
            vmem_limit_bytes=vmem_cap),
    )(xp, wdw)

    # ---- fold BN1 (global training-mode stats, biased var) into one affine --
    st1 = jnp.transpose(st1.sum(axis=0), (1, 0, 2)).reshape(2, Cp)
    mean1 = st1[0] / M
    var1 = st1[1] / M - mean1 * mean1
    inv1 = g * jax.lax.rsqrt(var1 + EPS)
    scale1 = inv1.reshape(1, Cp)
    shift1 = (b - mean1 * inv1).reshape(1, Cp)

    # --------- K2: BN1-affine + ReLU + pointwise -> BN2 partial stats --------
    def stats2_kernel(y_ref, sc_ref, sh_ref, w_ref, st_ref):
        h1 = jnp.maximum(y_ref[...] * sc_ref[...] + sh_ref[...], 0.0)
        h2 = jnp.dot(h1, w_ref[...], preferred_element_type=f32)   # MXU
        s = jnp.sum(h2, axis=0, keepdims=True)
        ss = jnp.sum(h2 * h2, axis=0, keepdims=True)
        st_ref[...] = jnp.concatenate([s, ss], axis=0)[None]

    st2 = pl.pallas_call(
        stats2_kernel,
        grid=(n_tiles,),
        in_specs=[
            pl.BlockSpec((TM, Cp), lambda i: (i, 0)),
            pl.BlockSpec((1, Cp), lambda i: (0, 0)),
            pl.BlockSpec((1, Cp), lambda i: (0, 0)),
            pl.BlockSpec((Cp, Cp), lambda i: (0, 0)),
        ],
        out_specs=pl.BlockSpec((1, 2, Cp), lambda i: (i, 0, 0)),
        out_shape=jax.ShapeDtypeStruct((n_tiles, 2, Cp), f32),
        compiler_params=cparams_1d,
    )(y1, scale1, shift1, wpw)

    st2 = st2.sum(axis=0)
    mean2 = st2[0] / M
    var2 = st2[1] / M - mean2 * mean2
    inv2 = g * jax.lax.rsqrt(var2 + EPS)
    scale2 = inv2.reshape(1, Cp)
    shift2 = (b - mean2 * inv2).reshape(1, Cp)

    # -------- K3: fused BN1+ReLU -> pointwise -> BN2+ReLU -> final output ----
    def pw_kernel(y_ref, sc1_ref, sh1_ref, w_ref, sc2_ref, sh2_ref, o_ref):
        h1 = jnp.maximum(y_ref[...] * sc1_ref[...] + sh1_ref[...], 0.0)
        h2 = jnp.dot(h1, w_ref[...], preferred_element_type=f32)   # MXU
        o_ref[...] = jnp.maximum(h2 * sc2_ref[...] + sh2_ref[...], 0.0)

    out_flat = pl.pallas_call(
        pw_kernel,
        grid=(n_tiles,),
        in_specs=[
            pl.BlockSpec((TM, Cp), lambda i: (i, 0)),
            pl.BlockSpec((1, Cp), lambda i: (0, 0)),
            pl.BlockSpec((1, Cp), lambda i: (0, 0)),
            pl.BlockSpec((Cp, Cp), lambda i: (0, 0)),
            pl.BlockSpec((1, Cp), lambda i: (0, 0)),
            pl.BlockSpec((1, Cp), lambda i: (0, 0)),
        ],
        out_specs=pl.BlockSpec((TM, Cp), lambda i: (i, 0)),
        out_shape=jax.ShapeDtypeStruct((M, Cp), f32),
        compiler_params=cparams_1d,
    )(y1, scale1, shift1, wpw, scale2, shift2)

    out = out_flat.reshape(N, H, W, Cp)[:, :, :, :C]
    return jnp.transpose(out, (0, 3, 1, 2))                        # back to NCHW


def _reference(x_nchw, w_dw, w_pw, gamma, beta):
    """Pure-JAX reference matching the PyTorch forward (training-mode BN)."""
    dn = ('NCHW', 'OIHW', 'NCHW')

    def bn_relu(y):
        mean = jnp.mean(y, axis=(0, 2, 3), keepdims=True)
        var = jnp.mean((y - mean) ** 2, axis=(0, 2, 3), keepdims=True)
        yh = (y - mean) * jax.lax.rsqrt(var + EPS)
        yh = yh * gamma.reshape(1, -1, 1, 1) + beta.reshape(1, -1, 1, 1)
        return jnp.maximum(yh, 0.0)

    y = jax.lax.conv_general_dilated(
        x_nchw, w_dw, (1, 1), ((1, 1), (1, 1)),
        feature_group_count=x_nchw.shape[1], dimension_numbers=dn)
    y = bn_relu(y)
    y = jax.lax.conv_general_dilated(
        y, w_pw, (1, 1), ((0, 0), (0, 0)), dimension_numbers=dn)
    return bn_relu(y)


if __name__ == "__main__":
    N, C, H, W = 2, 4, 16, 16        # in_channels == out_channels == 4

    key = jax.random.PRNGKey(0)
    kx, kd, kp = jax.random.split(key, 3)

    x = jax.random.normal(kx, (N, C, H, W), dtype=jnp.float32)
    w_depthwise = jax.random.normal(kd, (C, 1, KH, KW), dtype=jnp.float32) * 0.2
    w_pointwise = jax.random.normal(kp, (C, C, 1, 1), dtype=jnp.float32) * 0.2
    bn_gamma = jnp.ones((C,), dtype=jnp.float32)    # PyTorch BN default init
    bn_beta = jnp.zeros((C,), dtype=jnp.float32)

    out = depthwise_separable_conv(x, w_depthwise, w_pointwise, bn_gamma, bn_beta)
    out = jax.block_until_ready(out)

    ref = jax.block_until_ready(
        _reference(x, w_depthwise, w_pointwise, bn_gamma, bn_beta))
    assert out.shape == (N, C, H, W)
    assert jnp.allclose(out, ref, atol=1e-4, rtol=1e-4), "mismatch vs reference"

    print("KERNEL_OK")
</pallas_src>

<mosaic_0001>
module attributes {stable_mosaic.version = 11 : i64} {
  func.func @stats2_kernel(%arg0: i32, %arg1: memref<128x128xf32, #tpu.memory_space<vmem>>, %arg2: memref<1x128xf32, #tpu.memory_space<vmem>>, %arg3: memref<1x128xf32, #tpu.memory_space<vmem>>, %arg4: memref<128x128xf32, #tpu.memory_space<vmem>>, %arg5: memref<1x2x128xf32, #tpu.memory_space<vmem>>) attributes {dimension_semantics = [#tpu.dimension_semantics<parallel>], iteration_bounds = array<i64: 4>, scalar_prefetch = 0 : i64, scratch_operands = 0 : i64, tpu.core_type = #tpu.core_type<tc>, window_params = [{transform_indices = @transform_0, window_bounds = array<i64: 128, 128>}, {pipeline_mode = #tpu.pipeline_mode<synchronous>, transform_indices = @transform_1, window_bounds = array<i64: 1, 128>}, {pipeline_mode = #tpu.pipeline_mode<synchronous>, transform_indices = @transform_2, window_bounds = array<i64: 1, 128>}, {pipeline_mode = #tpu.pipeline_mode<synchronous>, transform_indices = @transform_3, window_bounds = array<i64: 128, 128>}, {transform_indices = @transform_4, window_bounds = array<i64: 1, 2, 128>}]} {
    %c0 = arith.constant 0 : index
    %c0_0 = arith.constant 0 : index
    %0 = vector.load %arg1[%c0, %c0_0] : memref<128x128xf32, #tpu.memory_space<vmem>>, vector<128x128xf32>
    %c0_1 = arith.constant 0 : index
    %c0_2 = arith.constant 0 : index
    %1 = vector.load %arg2[%c0_1, %c0_2] : memref<1x128xf32, #tpu.memory_space<vmem>>, vector<1x128xf32>
    %2 = vector.broadcast %1 : vector<1x128xf32> to vector<128x128xf32>
    %3 = arith.mulf %0, %2 : vector<128x128xf32>
    %c0_3 = arith.constant 0 : index
    %c0_4 = arith.constant 0 : index
    %4 = vector.load %arg3[%c0_3, %c0_4] : memref<1x128xf32, #tpu.memory_space<vmem>>, vector<1x128xf32>
    %5 = vector.broadcast %4 : vector<1x128xf32> to vector<128x128xf32>
    %6 = arith.addf %3, %5 : vector<128x128xf32>
    %cst = arith.constant 0.000000e+00 : f32
    %7 = vector.broadcast %cst : f32 to vector<128x128xf32>
    %8 = arith.maximumf %6, %7 : vector<128x128xf32>
    %c0_5 = arith.constant 0 : index
    %c0_6 = arith.constant 0 : index
    %9 = vector.load %arg4[%c0_5, %c0_6] : memref<128x128xf32, #tpu.memory_space<vmem>>, vector<128x128xf32>
    %cst_7 = arith.constant dense<0.000000e+00> : vector<128x128xf32>
    %10 = tpu.matmul %8, %9, %cst_7 {dimension_numbers = #tpu.dot_dimension_numbers<[1], [0], [0], [1], [0, 0, 1, 1], [], []>} : vector<128x128xf32>, vector<128x128xf32>, vector<128x128xf32> -> vector<128x128xf32>
    %cst_8 = arith.constant dense<0.000000e+00> : vector<128xf32>
    %11 = vector.multi_reduction <add>, %10, %cst_8 [0] : vector<128x128xf32> to vector<128xf32>
    %12 = vector.shape_cast %11 : vector<128xf32> to vector<1x128xf32>
    %13 = arith.mulf %10, %10 : vector<128x128xf32>
    %cst_9 = arith.constant dense<0.000000e+00> : vector<128xf32>
    %14 = vector.multi_reduction <add>, %13, %cst_9 [0] : vector<128x128xf32> to vector<128xf32>
    %15 = vector.shape_cast %14 : vector<128xf32> to vector<1x128xf32>
    %16 = tpu.concatenate %12, %15 in 0 : vector<1x128xf32>, vector<1x128xf32> -> vector<2x128xf32>
    %17 = vector.shape_cast %16 : vector<2x128xf32> to vector<1x2x128xf32>
    %c0_10 = arith.constant 0 : index
    %c0_11 = arith.constant 0 : index
    %c0_12 = arith.constant 0 : index
    %18 = vector.load %arg5[%c0_10, %c0_11, %c0_12] : memref<1x2x128xf32, #tpu.memory_space<vmem>>, vector<1x2x128xf32>
    tpu.vector_store %arg5[%c0_10, %c0_11, %c0_12], %17 {strides = array<i32>} : memref<1x2x128xf32, #tpu.memory_space<vmem>>, vector<1x2x128xf32>,
    return
  }
  func.func @transform_0(%arg0: i32) -> (i32, i32) {
    %c0_i32 = arith.constant 0 : i32
    %c0_i32_0 = arith.constant 0 : i32
    return %arg0, %c0_i32 : i32, i32
  }
  func.func @transform_1(%arg0: i32) -> (i32, i32) {
    %c0_i32 = arith.constant 0 : i32
    %c0_i32_0 = arith.constant 0 : i32
    %c0_i32_1 = arith.constant 0 : i32
    return %c0_i32, %c0_i32_0 : i32, i32
  }
  func.func @transform_2(%arg0: i32) -> (i32, i32) {
    %c0_i32 = arith.constant 0 : i32
    %c0_i32_0 = arith.constant 0 : i32
    %c0_i32_1 = arith.constant 0 : i32
    return %c0_i32, %c0_i32_0 : i32, i32
  }
  func.func @transform_3(%arg0: i32) -> (i32, i32) {
    %c0_i32 = arith.constant 0 : i32
    %c0_i32_0 = arith.constant 0 : i32
    %c0_i32_1 = arith.constant 0 : i32
    return %c0_i32, %c0_i32_0 : i32, i32
  }
  func.func @transform_4(%arg0: i32) -> (i32, i32, i32) {
    %c0_i32 = arith.constant 0 : i32
    %c0_i32_0 = arith.constant 0 : i32
    %c0_i32_1 = arith.constant 0 : i32
    return %arg0, %c0_i32, %c0_i32_0 : i32, i32, i32
  }
}

module attributes {stable_mosaic.version = 11 : i64} {
  func.func @dw_kernel(%arg0: i32, %arg1: i32, %arg2: memref<1x432x128xf32, #tpu.memory_space<vmem>>, %arg3: memref<9x128xf32, #tpu.memory_space<vmem>>, %arg4: memref<256x128xf32, #tpu.memory_space<vmem>>, %arg5: memref<1x1x2x128xf32, #tpu.memory_space<vmem>>) attributes {dimension_semantics = [#tpu.dimension_semantics<parallel>, #tpu.dimension_semantics<parallel>], iteration_bounds = array<i64: 2, 1>, scalar_prefetch = 0 : i64, scratch_operands = 0 : i64, tpu.core_type = #tpu.core_type<tc>, window_params = [{transform_indices = @transform_0, window_bounds = array<i64: 1, 432, 128>}, {transform_indices = @transform_1, window_bounds = array<i64: 9, 128>}, {transform_indices = @transform_2, window_bounds = array<i64: 256, 128>}, {transform_indices = @transform_3, window_bounds = array<i64: 1, 1, 2, 128>}]} {
    %c0 = arith.constant 0 : index
    %c0_0 = arith.constant 0 : index
    %c0_1 = arith.constant 0 : index
    %0 = vector.load %arg2[%c0, %c0_0, %c0_1] : memref<1x432x128xf32, #tpu.memory_space<vmem>>, vector<1x432x128xf32>
    %1 = vector.shape_cast %0 : vector<1x432x128xf32> to vector<432x128xf32>
    %c0_2 = arith.constant 0 : index
    %c0_3 = arith.constant 0 : index
    %2 = vector.load %arg3[%c0_2, %c0_3] : memref<9x128xf32, #tpu.memory_space<vmem>>, vector<9x128xf32>
    %cst = arith.constant 0.000000e+00 : f32
    %3 = vector.broadcast %cst : f32 to vector<384x128xf32>
    %4 = vector.extract_strided_slice %1 {offsets = [0, 0], sizes = [384, 128], strides = [1, 1]} : vector<432x128xf32> to vector<384x128xf32>
    %5 = vector.extract_strided_slice %2 {offsets = [0, 0], sizes = [1, 128], strides = [1, 1]} : vector<9x128xf32> to vector<1x128xf32>
    %6 = vector.shape_cast %5 : vector<1x128xf32> to vector<128xf32>
    %7 = vector.shape_cast %6 : vector<128xf32> to vector<1x128xf32>
    %8 = vector.broadcast %7 : vector<1x128xf32> to vector<384x128xf32>
    %9 = arith.mulf %4, %8 : vector<384x128xf32>
    %10 = arith.addf %3, %9 : vector<384x128xf32>
    %11 = vector.extract_strided_slice %1 {offsets = [24, 0], sizes = [384, 128], strides = [1, 1]} : vector<432x128xf32> to vector<384x128xf32>
    %12 = vector.extract_strided_slice %2 {offsets = [3, 0], sizes = [1, 128], strides = [1, 1]} : vector<9x128xf32> to vector<1x128xf32>
    %13 = vector.shape_cast %12 : vector<1x128xf32> to vector<128xf32>
    %14 = vector.shape_cast %13 : vector<128xf32> to vector<1x128xf32>
    %15 = vector.broadcast %14 : vector<1x128xf32> to vector<384x128xf32>
    %16 = arith.mulf %11, %15 : vector<384x128xf32>
    %17 = arith.addf %10, %16 : vector<384x128xf32>
    %18 = vector.extract_strided_slice %1 {offsets = [48, 0], sizes = [384, 128], strides = [1, 1]} : vector<432x128xf32> to vector<384x128xf32>
    %19 = vector.extract_strided_slice %2 {offsets = [6, 0], sizes = [1, 128], strides = [1, 1]} : vector<9x128xf32> to vector<1x128xf32>
    %20 = vector.shape_cast %19 : vector<1x128xf32> to vector<128xf32>
    %21 = vector.shape_cast %20 : vector<128xf32> to vector<1x128xf32>
    %22 = vector.broadcast %21 : vector<1x128xf32> to vector<384x128xf32>
    %23 = arith.mulf %18, %22 : vector<384x128xf32>
    %24 = arith.addf %17, %23 : vector<384x128xf32>
    %c431_i32 = arith.constant 431 : i32
    %25 = tpu.dynamic_rotate %1 by %c431_i32 dim 0 : vector<432x128xf32>, i32 -> vector<432x128xf32>
    %26 = vector.extract_strided_slice %25 {offsets = [0, 0], sizes = [384, 128], strides = [1, 1]} : vector<432x128xf32> to vector<384x128xf32>
    %27 = vector.extract_strided_slice %2 {offsets = [1, 0], sizes = [1, 128], strides = [1, 1]} : vector<9x128xf32> to vector<1x128xf32>
    %28 = vector.shape_cast %27 : vector<1x128xf32> to vector<128xf32>
    %29 = vector.shape_cast %28 : vector<128xf32> to vector<1x128xf32>
    %30 = vector.broadcast %29 : vector<1x128xf32> to vector<384x128xf32>
    %31 = arith.mulf %26, %30 : vector<384x128xf32>
    %32 = arith.addf %24, %31 : vector<384x128xf32>
    %33 = vector.extract_strided_slice %25 {offsets = [24, 0], sizes = [384, 128], strides = [1, 1]} : vector<432x128xf32> to vector<384x128xf32>
    %34 = vector.extract_strided_slice %2 {offsets = [4, 0], sizes = [1, 128], strides = [1, 1]} : vector<9x128xf32> to vector<1x128xf32>
    %35 = vector.shape_cast %34 : vector<1x128xf32> to vector<128xf32>
    %36 = vector.shape_cast %35 : vector<128xf32> to vector<1x128xf32>
    %37 = vector.broadcast %36 : vector<1x128xf32> to vector<384x128xf32>
    %38 = arith.mulf %33, %37 : vector<384x128xf32>
    %39 = arith.addf %32, %38 : vector<384x128xf32>
    %40 = vector.extract_strided_slice %25 {offsets = [48, 0], sizes = [384, 128], strides = [1, 1]} : vector<432x128xf32> to vector<384x128xf32>
    %41 = vector.extract_strided_slice %2 {offsets = [7, 0], sizes = [1, 128], strides = [1, 1]} : vector<9x128xf32> to vector<1x128xf32>
    %42 = vector.shape_cast %41 : vector<1x128xf32> to vector<128xf32>
    %43 = vector.shape_cast %42 : vector<128xf32> to vector<1x128xf32>
    %44 = vector.broadcast %43 : vector<1x128xf32> to vector<384x128xf32>
    %45 = arith.mulf %40, %44 : vector<384x128xf32>
    %46 = arith.addf %39, %45 : vector<384x128xf32>
    %c430_i32 = arith.constant 430 : i32
    %47 = tpu.dynamic_rotate %1 by %c430_i32 dim 0 : vector<432x128xf32>, i32 -> vector<432x128xf32>
    %48 = vector.extract_strided_slice %47 {offsets = [0, 0], sizes = [384, 128], strides = [1, 1]} : vector<432x128xf32> to vector<384x128xf32>
    %49 = vector.extract_strided_slice %2 {offsets = [2, 0], sizes = [1, 128], strides = [1, 1]} : vector<9x128xf32> to vector<1x128xf32>
    %50 = vector.shape_cast %49 : vector<1x128xf32> to vector<128xf32>
    %51 = vector.shape_cast %50 : vector<128xf32> to vector<1x128xf32>
    %52 = vector.broadcast %51 : vector<1x128xf32> to vector<384x128xf32>
    %53 = arith.mulf %48, %52 : vector<384x128xf32>
    %54 = arith.addf %46, %53 : vector<384x128xf32>
    %55 = vector.extract_strided_slice %47 {offsets = [24, 0], sizes = [384, 128], strides = [1, 1]} : vector<432x128xf32> to vector<384x128xf32>
    %56 = vector.extract_strided_slice %2 {offsets = [5, 0], sizes = [1, 128], strides = [1, 1]} : vector<9x128xf32> to vector<1x128xf32>
    %57 = vector.shape_cast %56 : vector<1x128xf32> to vector<128xf32>
    %58 = vector.shape_cast %57 : vector<128xf32> to vector<1x128xf32>
    %59 = vector.broadcast %58 : vector<1x128xf32> to vector<384x128xf32>
    %60 = arith.mulf %55, %59 : vector<384x128xf32>
    %61 = arith.addf %54, %60 : vector<384x128xf32>
    %62 = vector.extract_strided_slice %47 {offsets = [48, 0], sizes = [384, 128], strides = [1, 1]} : vector<432x128xf32> to vector<384x128xf32>
    %63 = vector.extract_strided_slice %2 {offsets = [8, 0], sizes = [1, 128], strides = [1, 1]} : vector<9x128xf32> to vector<1x128xf32>
    %64 = vector.shape_cast %63 : vector<1x128xf32> to vector<128xf32>
    %65 = vector.shape_cast %64 : vector<128xf32> to vector<1x128xf32>
    %66 = vector.broadcast %65 : vector<1x128xf32> to vector<384x128xf32>
    %67 = arith.mulf %62, %66 : vector<384x128xf32>
    %68 = arith.addf %61, %67 : vector<384x128xf32>
    %69 = vector.shape_cast %68 : vector<384x128xf32> to vector<16x24x128xf32>
    %70 = vector.extract_strided_slice %69 {offsets = [0, 0, 0], sizes = [16, 16, 128], strides = [1, 1, 1]} : vector<16x24x128xf32> to vector<16x16x128xf32>
    %71 = vector.shape_cast %70 : vector<16x16x128xf32> to vector<256x128xf32>
    %c0_4 = arith.constant 0 : index
    %c0_5 = arith.constant 0 : index
    %72 = vector.load %arg4[%c0_4, %c0_5] : memref<256x128xf32, #tpu.memory_space<vmem>>, vector<256x128xf32>
    tpu.vector_store %arg4[%c0_4, %c0_5], %71 {strides = array<i32>} : memref<256x128xf32, #tpu.memory_space<vmem>>, vector<256x128xf32>,
    %cst_6 = arith.constant dense<0.000000e+00> : vector<128xf32>
    %73 = vector.multi_reduction <add>, %71, %cst_6 [0] : vector<256x128xf32> to vector<128xf32>
    %74 = vector.shape_cast %73 : vector<128xf32> to vector<1x128xf32>
    %75 = arith.mulf %71, %71 : vector<256x128xf32>
    %cst_7 = arith.constant dense<0.000000e+00> : vector<128xf32>
    %76 = vector.multi_reduction <add>, %75, %cst_7 [0] : vector<256x128xf32> to vector<128xf32>
    %77 = vector.shape_cast %76 : vector<128xf32> to vector<1x128xf32>
    %78 = tpu.concatenate %74, %77 in 0 : vector<1x128xf32>, vector<1x128xf32> -> vector<2x128xf32>
    %79 = vector.shape_cast %78 : vector<2x128xf32> to vector<1x1x2x128xf32>
    %c0_8 = arith.constant 0 : index
    %c0_9 = arith.constant 0 : index
    %c0_10 = arith.constant 0 : index
    %c0_11 = arith.constant 0 : index
    %80 = vector.load %arg5[%c0_8, %c0_9, %c0_10, %c0_11] : memref<1x1x2x128xf32, #tpu.memory_space<vmem>>, vector<1x1x2x128xf32>
    tpu.vector_store %arg5[%c0_8, %c0_9, %c0_10, %c0_11], %79 {strides = array<i32>} : memref<1x1x2x128xf32, #tpu.memory_space<vmem>>, vector<1x1x2x128xf32>,
    return
  }
  func.func @transform_0(%arg0: i32, %arg1: i32) -> (i32, i32, i32) {
    %c0_i32 = arith.constant 0 : i32
    %c0_i32_0 = arith.constant 0 : i32
    return %arg0, %c0_i32, %arg1 : i32, i32, i32
  }
  func.func @transform_1(%arg0: i32, %arg1: i32) -> (i32, i32) {
    %c0_i32 = arith.constant 0 : i32
    %c0_i32_0 = arith.constant 0 : i32
    return %c0_i32, %arg1 : i32, i32
  }
  func.func @transform_2(%arg0: i32, %arg1: i32) -> (i32, i32) {
    %c0_i32 = arith.constant 0 : i32
    return %arg0, %arg1 : i32, i32
  }
  func.func @transform_3(%arg0: i32, %arg1: i32) -> (i32, i32, i32, i32) {
    %c0_i32 = arith.constant 0 : i32
    %c0_i32_0 = arith.constant 0 : i32
    %c0_i32_1 = arith.constant 0 : i32
    return %arg0, %arg1, %c0_i32, %c0_i32_0 : i32, i32, i32, i32
  }
}

module attributes {stable_mosaic.version = 11 : i64} {
  func.func @pw_kernel(%arg0: i32, %arg1: memref<128x128xf32, #tpu.memory_space<vmem>>, %arg2: memref<1x128xf32, #tpu.memory_space<vmem>>, %arg3: memref<1x128xf32, #tpu.memory_space<vmem>>, %arg4: memref<128x128xf32, #tpu.memory_space<vmem>>, %arg5: memref<1x128xf32, #tpu.memory_space<vmem>>, %arg6: memref<1x128xf32, #tpu.memory_space<vmem>>, %arg7: memref<128x128xf32, #tpu.memory_space<vmem>>) attributes {dimension_semantics = [#tpu.dimension_semantics<parallel>], iteration_bounds = array<i64: 4>, scalar_prefetch = 0 : i64, scratch_operands = 0 : i64, tpu.core_type = #tpu.core_type<tc>, window_params = [{transform_indices = @transform_0, window_bounds = array<i64: 128, 128>}, {pipeline_mode = #tpu.pipeline_mode<synchronous>, transform_indices = @transform_1, window_bounds = array<i64: 1, 128>}, {pipeline_mode = #tpu.pipeline_mode<synchronous>, transform_indices = @transform_2, window_bounds = array<i64: 1, 128>}, {pipeline_mode = #tpu.pipeline_mode<synchronous>, transform_indices = @transform_3, window_bounds = array<i64: 128, 128>}, {pipeline_mode = #tpu.pipeline_mode<synchronous>, transform_indices = @transform_4, window_bounds = array<i64: 1, 128>}, {pipeline_mode = #tpu.pipeline_mode<synchronous>, transform_indices = @transform_5, window_bounds = array<i64: 1, 128>}, {transform_indices = @transform_6, window_bounds = array<i64: 128, 128>}]} {
    %c0 = arith.constant 0 : index
    %c0_0 = arith.constant 0 : index
    %0 = vector.load %arg1[%c0, %c0_0] : memref<128x128xf32, #tpu.memory_space<vmem>>, vector<128x128xf32>
    %c0_1 = arith.constant 0 : index
    %c0_2 = arith.constant 0 : index
    %1 = vector.load %arg2[%c0_1, %c0_2] : memref<1x128xf32, #tpu.memory_space<vmem>>, vector<1x128xf32>
    %2 = vector.broadcast %1 : vector<1x128xf32> to vector<128x128xf32>
    %3 = arith.mulf %0, %2 : vector<128x128xf32>
    %c0_3 = arith.constant 0 : index
    %c0_4 = arith.constant 0 : index
    %4 = vector.load %arg3[%c0_3, %c0_4] : memref<1x128xf32, #tpu.memory_space<vmem>>, vector<1x128xf32>
    %5 = vector.broadcast %4 : vector<1x128xf32> to vector<128x128xf32>
    %6 = arith.addf %3, %5 : vector<128x128xf32>
    %cst = arith.constant 0.000000e+00 : f32
    %7 = vector.broadcast %cst : f32 to vector<128x128xf32>
    %8 = arith.maximumf %6, %7 : vector<128x128xf32>
    %c0_5 = arith.constant 0 : index
    %c0_6 = arith.constant 0 : index
    %9 = vector.load %arg4[%c0_5, %c0_6] : memref<128x128xf32, #tpu.memory_space<vmem>>, vector<128x128xf32>
    %cst_7 = arith.constant dense<0.000000e+00> : vector<128x128xf32>
    %10 = tpu.matmul %8, %9, %cst_7 {dimension_numbers = #tpu.dot_dimension_numbers<[1], [0], [0], [1], [0, 0, 1, 1], [], []>} : vector<128x128xf32>, vector<128x128xf32>, vector<128x128xf32> -> vector<128x128xf32>
    %c0_8 = arith.constant 0 : index
    %c0_9 = arith.constant 0 : index
    %11 = vector.load %arg5[%c0_8, %c0_9] : memref<1x128xf32, #tpu.memory_space<vmem>>, vector<1x128xf32>
    %12 = vector.broadcast %11 : vector<1x128xf32> to vector<128x128xf32>
    %13 = arith.mulf %10, %12 : vector<128x128xf32>
    %c0_10 = arith.constant 0 : index
    %c0_11 = arith.constant 0 : index
    %14 = vector.load %arg6[%c0_10, %c0_11] : memref<1x128xf32, #tpu.memory_space<vmem>>, vector<1x128xf32>
    %15 = vector.broadcast %14 : vector<1x128xf32> to vector<128x128xf32>
    %16 = arith.addf %13, %15 : vector<128x128xf32>
    %cst_12 = arith.constant 0.000000e+00 : f32
    %17 = vector.broadcast %cst_12 : f32 to vector<128x128xf32>
    %18 = arith.maximumf %16, %17 : vector<128x128xf32>
    %c0_13 = arith.constant 0 : index
    %c0_14 = arith.constant 0 : index
    %19 = vector.load %arg7[%c0_13, %c0_14] : memref<128x128xf32, #tpu.memory_space<vmem>>, vector<128x128xf32>
    tpu.vector_store %arg7[%c0_13, %c0_14], %18 {strides = array<i32>} : memref<128x128xf32, #tpu.memory_space<vmem>>, vector<128x128xf32>,
    return
  }
  func.func @transform_0(%arg0: i32) -> (i32, i32) {
    %c0_i32 = arith.constant 0 : i32
    %c0_i32_0 = arith.constant 0 : i32
    return %arg0, %c0_i32 : i32, i32
  }
  func.func @transform_1(%arg0: i32) -> (i32, i32) {
    %c0_i32 = arith.constant 0 : i32
    %c0_i32_0 = arith.constant 0 : i32
    %c0_i32_1 = arith.constant 0 : i32
    return %c0_i32, %c0_i32_0 : i32, i32
  }
  func.func @transform_2(%arg0: i32) -> (i32, i32) {
    %c0_i32 = arith.constant 0 : i32
    %c0_i32_0 = arith.constant 0 : i32
    %c0_i32_1 = arith.constant 0 : i32
    return %c0_i32, %c0_i32_0 : i32, i32
  }
  func.func @transform_3(%arg0: i32) -> (i32, i32) {
    %c0_i32 = arith.constant 0 : i32
    %c0_i32_0 = arith.constant 0 : i32
    %c0_i32_1 = arith.constant 0 : i32
    return %c0_i32, %c0_i32_0 : i32, i32
  }
  func.func @transform_4(%arg0: i32) -> (i32, i32) {
    %c0_i32 = arith.constant 0 : i32
    %c0_i32_0 = arith.constant 0 : i32
    %c0_i32_1 = arith.constant 0 : i32
    return %c0_i32, %c0_i32_0 : i32, i32
  }
  func.func @transform_5(%arg0: i32) -> (i32, i32) {
    %c0_i32 = arith.constant 0 : i32
    %c0_i32_0 = arith.constant 0 : i32
    %c0_i32_1 = arith.constant 0 : i32
    return %c0_i32, %c0_i32_0 : i32, i32
  }
  func.func @transform_6(%arg0: i32) -> (i32, i32) {
    %c0_i32 = arith.constant 0 : i32
    %c0_i32_0 = arith.constant 0 : i32
    return %arg0, %c0_i32 : i32, i32
  }
}

</mosaic_0001>

<bundles_post_ra>
// kernel: depthwise_separable_conv.4
= control target key start
LH: loop header
LB: loop body
LE: loop exit
PB: predicated region body
PF: predicated region fallthrough
CT: control target
= control target key end

     0   :  { %s740_s15 = smov 0   ;;  %s870_s0 = inlined_call_operand.vmem [shape: f32[512,128], index: 0, kind: input, shape index: {}]   ;;  %s871_s1 = inlined_call_operand.vmem [shape: f32[1,128], index: 1, kind: input, shape index: {}]   ;;  %s872_s2 = inlined_call_operand.vmem [shape: f32[1,128], index: 2, kind: input, shape index: {}]   ;;  %s873_s3 = inlined_call_operand.vmem [shape: f32[128,128], index: 3, kind: input, shape index: {}]   ;;  %s874_s4 = inlined_call_operand.vmem [shape: f32[4,2,128], index: 4, kind: output, shape index: {}]  }
   0x1 LB: > { %s746_s16 = sadd.s32 4294967295, %s713_s15   ;;  %p555_p0 = scmp.ge.s32.totalorder %s713_s15, 1  ;;  %s713_s15 = sphi %s740_s15, %s14_s15  }
   0x2   : > { %p163_p1 = scmp.lt.s32.totalorder %s713_s15, 5 }
   0x4   : > { %p164_p2 = pnand %p555_p0, %p163_p1 }
   0x5   : > { %v276_v0 = vld [vmem:[%s873_s3] sm:$0xff] (!%p164_p2)  ;;  %v277_v1 = vld [vmem:[%s873_s3 + $0x8] sm:$0xff] (!%p164_p2)  ;;  %v278_v2 = vld [vmem:[%s873_s3 + $0x10] sm:$0xff] (!%p164_p2)  ;;  %s556_s23 = sshll.u32 (!%p164_p2), %s746_s16, 4  ;;  %p194_p4 = scmp.lt.s32.totalorder (!%p164_p2), %s746_s16, 3  ;;  %vm495_vm0 = vcmask (!%p164_p2), 1040384  }
   0x6   : > { %167 = sbr.rel (%p164_p2) target bundleno = 301 (0x12d), region = 36  ;;  %v651_v3 = vpack.c.bf16 (!%p164_p2), %v277_v1, %v276_v0  ;;  %v279_v4 = vld [vmem:[%s873_s3 + $0x18] sm:$0xff] (!%p164_p2)  ;;  %p189_p3 = scmp.lt.s32.totalorder (!%p164_p2), %s556_s23, 63  ;;  %v280_v6 = vld [vmem:[%s873_s3 + $0x20] sm:$0xff] (!%p164_p2)  ;;  %v281_v7 = vld [vmem:[%s873_s3 + $0x28] sm:$0xff] (!%p164_p2) }
   0x7   : > { %v655_v5 = vpack.c.bf16 (!%p164_p2), %v279_v4, %v278_v2  ;;  %v659_v8 = vpack.c.bf16 (!%p164_p2), %v281_v7, %v280_v6  ;;  %v772_v9 = vld [vmem:[%s871_s1] ss:$0 sm:$0xff] (!%p164_p2)  ;;  %v282_v10 = vld [vmem:[%s873_s3 + $0x30] sm:$0xff] (!%p164_p2)  ;;  %v283_v11 = vld [vmem:[%s873_s3 + $0x38] sm:$0xff] (!%p164_p2) }
   0x8   : > { %652 = vmatprep.subr.bf16.mxu0 (!%p164_p2), %v651_v3  ;;  %683 = vmatprep.subr.bf16.mxu1 (!%p164_p2), %v651_v3  ;;  %v789_v13 = vld [vmem:[%s872_s2] ss:$0 sm:$0xff] (!%p164_p2)  ;;  %v663_v15 = vpack.c.bf16 (!%p164_p2), %v283_v11, %v282_v10  ;;  %v285_v17 = vld [vmem:[%s873_s3 + $0x48] sm:$0xff] (!%p164_p2)  ;;  %v286_v22 = vld [vmem:[%s873_s3 + $0x50] sm:$0xff] (!%p164_p2) }
   0x9   : > { %654 = vmatpush3.bf16.msra.mxu0 (!%p164_p2), %v651_v3  ;;  %691 = vmatpush3.bf16.msra.mxu1 (!%p164_p2), %v651_v3  ;;  %v284_v16 = vld [vmem:[%s873_s3 + $0x40] sm:$0xff] (!%p164_p2)  ;;  %v287_v23 = vld [vmem:[%s873_s3 + $0x58] sm:$0xff] (!%p164_p2)  ;;  %v289_v28 = vld [vmem:[%s873_s3 + $0x68] sm:$0xff] (!%p164_p2) }
   0xa   : > { %656 = vmatprep.subr.bf16.mxu0 (!%p164_p2), %v655_v5  ;;  %684 = vmatprep.subr.bf16.mxu1 (!%p164_p2), %v655_v5  ;;  %v667_v21 = vpack.c.bf16 (!%p164_p2), %v285_v17, %v284_v16  ;;  %v671_v26 = vpack.c.bf16 (!%p164_p2), %v287_v23, %v286_v22  ;;  %v288_v27 = vld [vmem:[%s873_s3 + $0x60] sm:$0xff] (!%p164_p2)  ;;  %v290_v35 = vld [vmem:[%s873_s3 + $0x70] sm:$0xff] (!%p164_p2)  ;;  %v291_v36 = vld [vmem:[%s873_s3 + $0x78] sm:$0xff] (!%p164_p2) }
   0xb   : > { %v675_v32 = vpack.c.bf16 (!%p164_p2), %v289_v28, %v288_v27  ;;  %v679_v44 = vpack.c.bf16 (!%p164_p2), %v291_v36, %v290_v35 }
   0xd   : > { %s876_s23 = smov (!%p189_p3, %s556_s23), 63  ;;  %658 = vmatpush3.bf16.msra.mxu0 %v655_v5  ;;  %692 = vmatpush3.bf16.msra.mxu1 %v655_v5  ;;  %s878_s16 = smov (!%p194_p4, %s746_s16), 3 }
   0xe   : > { %s557_s30 = sshll.u32 %s876_s23, 3  ;;  %660 = vmatprep.subr.bf16.mxu0 %v659_v8  ;;  %685 = vmatprep.subr.bf16.mxu1 %v659_v8  ;;  %s558_s8 = sshll.u32 %s878_s16, 1 }
   0xf   : > { %s783_s13 = scalar_lea.vmem %s870_s0, %s557_s30  ;;  %s197_s11 = scalar_lea.vmem %s874_s4, %s558_s8 }
  0x10   : > { %v198_v12 = vld [vmem:[%s783_s13] sm:$0xff]  ;;  %v199_v30 = vld [vmem:[%s783_s13 + $0x8] sm:$0xff]  ;;  %v200_v33 = vld [vmem:[%s783_s13 + $0x10] sm:$0xff] }
  0x11   : > { %v221_v14 = vmul.f32 %v772_v9, %v198_v12  ;;  %v206_v19 = vld [vmem:[%s783_s13 + $0x40] sm:$0xff]  ;;  %662 = vmatpush3.bf16.msra.mxu0 %v659_v8  ;;  %693 = vmatpush3.bf16.msra.mxu1 %v659_v8  ;;  %v207_v31 = vld [vmem:[%s783_s13 + $0x48] sm:$0xff]  ;;  %v208_v34 = vld [vmem:[%s783_s13 + $0x50] sm:$0xff]  ;;  %v222_v37 = vmul.f32 %v772_v9, %v199_v30  ;;  %v223_v41 = vmul.f32 %v772_v9, %v200_v33 }
  0x12   : > { %664 = vmatprep.subr.bf16.mxu0 %v663_v15  ;;  %686 = vmatprep.subr.bf16.mxu1 %v663_v15  ;;  %v229_v24 = vmul.f32 %v772_v9, %v206_v19  ;;  %v201_v38 = vld [vmem:[%s783_s13 + $0x18] sm:$0xff]  ;;  %v202_v39 = vld [vmem:[%s783_s13 + $0x20] sm:$0xff]  ;;  %v230_v40 = vmul.f32 %v772_v9, %v207_v31  ;;  %v231_v42 = vmul.f32 %v772_v9, %v208_v34  ;;  %v203_v49 = vld [vmem:[%s783_s13 + $0x28] sm:$0xff] }
  0x13   : > { %v244_v18 = vadd.f32 %v789_v13, %v221_v14  ;;  %v209_v43 = vld [vmem:[%s783_s13 + $0x58] sm:$0xff]  ;;  %v210_v45 = vld [vmem:[%s783_s13 + $0x60] sm:$0xff]  ;;  %v224_v46 = vmul.f32 %v772_v9, %v201_v38  ;;  %v225_v47 = vmul.f32 %v772_v9, %v202_v39  ;;  %v245_v48 = vadd.f32 %v789_v13, %v222_v37  ;;  %v204_v50 = vld [vmem:[%s783_s13 + $0x30] sm:$0xff] }
  0x14   : > { %v252_v25 = vadd.f32 %v789_v13, %v229_v24  ;;  %v253_v51 = vadd.f32 %v789_v13, %v230_v40  ;;  %v232_v52 = vmul.f32 %v772_v9, %v209_v43  ;;  %v246_v53 = vadd.f32 %v789_v13, %v223_v41  ;;  %v211_v56 = vld [vmem:[%s783_s13 + $0x68] sm:$0xff]  ;;  %v212_v57 = vld [vmem:[%s783_s13 + $0x70] sm:$0xff]  ;;  %v205_v63 = vld [vmem:[%s783_s13 + $0x38] sm:$0xff] }
  0x15   : > { %v260_v20 = vmax.f32 %v244_v18, 0.0  ;;  %666 = vmatpush3.bf16.msra.mxu0 %v663_v15  ;;  %694 = vmatpush3.bf16.msra.mxu1 %v663_v15  ;;  %v254_v54 = vadd.f32 %v789_v13, %v231_v42  ;;  %v233_v55 = vmul.f32 %v772_v9, %v210_v45  ;;  %v247_v58 = vadd.f32 %v789_v13, %v224_v46  ;;  %v213_v7 = vld [vmem:[%s783_s13 + $0x78] sm:$0xff] }
  0x16   : > { %668 = vmatprep.subr.bf16.mxu0 %v667_v21  ;;  %687 = vmatprep.subr.bf16.mxu1 %v667_v21  ;;  %v268_v29 = vmax.f32 %v252_v25, 0.0  ;;  %v248_v59 = vadd.f32 %v789_v13, %v225_v47  ;;  %v226_v60 = vmul.f32 %v772_v9, %v203_v49  ;;  %v227_v61 = vmul.f32 %v772_v9, %v204_v50 }
  0x17   : > { %627 = vmatprep.mubr.f32.mxu0 %v260_v20  ;;  %v261_v62 = vmax.f32 %v245_v48, 0.0  ;;  %v269_v0 = vmax.f32 %v253_v51, 0.0  ;;  %v255_v1 = vadd.f32 %v789_v13, %v232_v52  ;;  %v234_v2 = vmul.f32 %v772_v9, %v211_v56 }
  0x18   : > { %639 = vmatprep.mubr.f32.mxu1 %v268_v29  ;;  %v262_v3 = vmax.f32 %v246_v53, 0.0  ;;  %v270_v4 = vmax.f32 %v254_v54, 0.0  ;;  %v256_v5 = vadd.f32 %v789_v13, %v233_v55  ;;  %v235_v6 = vmul.f32 %v772_v9, %v212_v57 }
  0x19   : > { %670 = vmatpush3.bf16.msra.mxu0 %v667_v21  ;;  %695 = vmatpush3.bf16.msra.mxu1 %v667_v21  ;;  %v249_v8 = vadd.f32 %v789_v13, %v226_v60  ;;  %v228_v10 = vmul.f32 %v772_v9, %v205_v63  ;;  %v263_v11 = vmax.f32 %v247_v58, 0.0  ;;  %v271_v12 = vmax.f32 %v255_v1, 0.0 }
  0x1a   : > { %672 = vmatprep.subr.bf16.mxu0 %v671_v26  ;;  %688 = vmatprep.subr.bf16.mxu1 %v671_v26  ;;  %v257_v14 = vadd.f32 %v789_v13, %v234_v2  ;;  %v236_v15 = vmul.f32 %v772_v9, %v213_v7  ;;  %v264_v16 = vmax.f32 %v248_v59, 0.0  ;;  %v250_v17 = vadd.f32 %v789_v13, %v227_v61 }
  0x1b   : > { %v272_v18 = vmax.f32 %v256_v5, 0.0  ;;  %v258_v19 = vadd.f32 %v789_v13, %v235_v6  ;;  %v265_v20 = vmax.f32 %v249_v8, 0.0  ;;  %v251_v21 = vadd.f32 %v789_v13, %v228_v10 }
  0x1c   : > { %v273_v22 = vmax.f32 %v257_v14, 0.0  ;;  %v259_v23 = vadd.f32 %v789_v13, %v236_v15  ;;  %v266_v24 = vmax.f32 %v250_v17, 0.0 }
  0x1d   : > { %674 = vmatpush3.bf16.msra.mxu0 %v671_v26  ;;  %696 = vmatpush3.bf16.msra.mxu1 %v671_v26  ;;  %v274_v9 = vmax.f32 %v258_v19, 0.0  ;;  %v267_v25 = vmax.f32 %v251_v21, 0.0 }
  0x1e   : > { %676 = vmatprep.subr.bf16.mxu0 %v675_v32  ;;  %689 = vmatprep.subr.bf16.mxu1 %v675_v32  ;;  %v275_v26 = vmax.f32 %v259_v23, 0.0 }
  0x21   : > { %678 = vmatpush3.bf16.msra.mxu0 %v675_v32  ;;  %697 = vmatpush3.bf16.msra.mxu1 %v675_v32 }
  0x22   : > { %680 = vmatprep.subr.bf16.mxu0 %v679_v44  ;;  %690 = vmatprep.subr.bf16.mxu1 %v679_v44 }
  0x25   : > { %682 = vmatpush3.bf16.msra.mxu0 %v679_v44  ;;  %698 = vmatpush3.bf16.msra.mxu1 %v679_v44 }
  0x28   : > { %628 = vmatmul.mubr.f32.vlgmr.msra.gmra.mrb[0].mxu0 %v261_v62  ;;  %640 = vmatmul.mubr.f32.vlgmr.msra.gmra.mrb[0].mxu1 %v269_v0 }
  0x29   : > { %630 = vmatprep.mubr.f32.mxu0 %v262_v3  ;;  %642 = vmatprep.mubr.f32.mxu1 %v270_v4 }
  0x2c   : > { %631 = vmatmul.mubr.f32.gmra.mrb[2].mxu0 %v263_v11  ;;  %643 = vmatmul.mubr.f32.gmra.mrb[2].mxu1 %v271_v12 }
  0x2d   : > { %633 = vmatprep.mubr.f32.mxu0 %v264_v16  ;;  %645 = vmatprep.mubr.f32.mxu1 %v272_v18 }
  0x30   : > { %634 = vmatmul.mubr.f32.gmra.mrb[4].mxu0 %v265_v20  ;;  %646 = vmatmul.mubr.f32.gmra.mrb[4].mxu1 %v273_v22 }
  0x31   : > { %636 = vmatprep.mubr.f32.mxu0 %v266_v24  ;;  %648 = vmatprep.mubr.f32.mxu1 %v274_v9 }
  0x34   : > { %637 = vmatmul.mubr.f32.gmra.mrb[6].mxu0 %v267_v25  ;;  %649 = vmatmul.mubr.f32.gmra.mrb[6].mxu1 %v275_v26 }
  0xfb   : > { %v629_v27 = vpop.f32.mrb[0].mxu0  ;;  %v641_v28 = vpop.f32.mrb[0].mxu1 }
  0xfc   : > { %v459_v29 = vmul.f32 %v629_v27, %v629_v27  ;;  %v358_v30 = vpop.f32.mrb[1].mxu0  ;;  %v398_v31 = vpop.f32.mrb[1].mxu1  ;;  %v467_v2 = vmul.f32 %v641_v28, %v641_v28 }
  0xfd   : > { %v437_v32 = vadd.f32 %v629_v27, %v358_v30  ;;  %v458_v33 = vmul.f32 %v358_v30, %v358_v30  ;;  %v466_v63 = vmul.f32 %v398_v31, %v398_v31 }
  0xff   : > { %v474_v13 = vadd.f32 %v459_v29, %v458_v33  ;;  %v632_v34 = vpop.f32.mrb[2].mxu0  ;;  %v644_v35 = vpop.f32.mrb[2].mxu1 }
 0x100   : > { %v368_v36 = vpop.f32.mrb[3].mxu0  ;;  %v408_v37 = vpop.f32.mrb[3].mxu1  ;;  %v461_v40 = vmul.f32 %v632_v34, %v632_v34  ;;  %v469_v8 = vmul.f32 %v644_v35, %v644_v35 }
 0x101   : > { %v438_v38 = vadd.f32 %v437_v32, %v368_v36  ;;  %v460_v39 = vmul.f32 %v368_v36, %v368_v36  ;;  %v468_v5 = vmul.f32 %v408_v37, %v408_v37 }
 0x103   : > { %v475_v41 = vadd.f32 %v474_v13, %v460_v39  ;;  %v635_v42 = vpop.f32.mrb[4].mxu0  ;;  %v439_v43 = vadd.f32 %v632_v34, %v438_v38  ;;  %v647_v44 = vpop.f32.mrb[4].mxu1 }
 0x104   : > { %v378_v45 = vpop.f32.mrb[5].mxu0  ;;  %v418_v46 = vpop.f32.mrb[5].mxu1  ;;  %v463_v50 = vmul.f32 %v635_v42, %v635_v42  ;;  %v471_v16 = vmul.f32 %v647_v44, %v647_v44 }
 0x105   : > { %v440_v47 = vadd.f32 %v439_v43, %v378_v45  ;;  %v462_v48 = vmul.f32 %v378_v45, %v378_v45  ;;  %v476_v49 = vadd.f32 %v475_v41, %v461_v40  ;;  %v470_v12 = vmul.f32 %v418_v46, %v418_v46 }
 0x107   : > { %v477_v51 = vadd.f32 %v476_v49, %v462_v48  ;;  %v638_v52 = vpop.f32.mrb[6].mxu0  ;;  %v441_v53 = vadd.f32 %v635_v42, %v440_v47  ;;  %v650_v54 = vpop.f32.mrb[6].mxu1 }
 0x108   : > { %v388_v55 = vpop.f32.mrb[7].mxu0  ;;  %v428_v56 = vpop.f32.mrb[7].mxu1  ;;  %v465_v60 = vmul.f32 %v638_v52, %v638_v52  ;;  %v473_v22 = vmul.f32 %v650_v54, %v650_v54 }
 0x109   : > { %v442_v57 = vadd.f32 %v441_v53, %v388_v55  ;;  %v464_v58 = vmul.f32 %v388_v55, %v388_v55  ;;  %v478_v59 = vadd.f32 %v477_v51, %v463_v50  ;;  %v472_v19 = vmul.f32 %v428_v56, %v428_v56 }
 0x10b   : > { %v443_v61 = vadd.f32 %v638_v52, %v442_v57  ;;  %v479_v62 = vadd.f32 %v478_v59, %v464_v58 }
 0x10d   : > { %v480_v0 = vadd.f32 %v479_v62, %v465_v60  ;;  %v444_v1 = vadd.f32 %v443_v61, %v398_v31 }
 0x10f   : > { %v481_v3 = vadd.f32 %v480_v0, %v466_v63  ;;  %v445_v4 = vadd.f32 %v641_v28, %v444_v1 }
 0x111   : > { %v446_v6 = vadd.f32 %v445_v4, %v408_v37  ;;  %v482_v7 = vadd.f32 %v481_v3, %v467_v2 }
 0x113   : > { %v483_v10 = vadd.f32 %v482_v7, %v468_v5  ;;  %v447_v11 = vadd.f32 %v644_v35, %v446_v6 }
 0x115   : > { %v448_v14 = vadd.f32 %v447_v11, %v418_v46  ;;  %v484_v15 = vadd.f32 %v483_v10, %v469_v8 }
 0x117   : > { %v485_v17 = vadd.f32 %v484_v15, %v470_v12  ;;  %v449_v18 = vadd.f32 %v647_v44, %v448_v14 }
 0x119   : > { %v450_v20 = vadd.f32 %v449_v18, %v428_v56  ;;  %v486_v21 = vadd.f32 %v485_v17, %v471_v16 }
 0x11b   : > { %v451_v23 = vadd.f32 %v650_v54, %v450_v20  ;;  %v487_v24 = vadd.f32 %v486_v21, %v472_v19 }
 0x11d   : > { %v452_v9 = vrot.slane %v451_v23, 4  ;;  %v488_v25 = vadd.f32 %v487_v24, %v473_v22 }
 0x11f   : > { %v453_v26 = vadd.f32 %v452_v9, %v451_v23  ;;  %v489_v27 = vrot.slane %v488_v25, 4 }
 0x121   : > { %v454_v28 = vrot.slane %v453_v26, 2  ;;  %v490_v29 = vadd.f32 %v489_v27, %v488_v25 }
 0x123   : > { %v455_v30 = vadd.f32 %v454_v28, %v453_v26  ;;  %v491_v31 = vrot.slane %v490_v29, 2 }
 0x125   : > { %v456_v32 = vrot.slane %v455_v30, 1  ;;  %v492_v33 = vadd.f32 %v491_v31, %v490_v29 }
 0x127   : > { %v493_v13 = vrot.slane %v492_v33, 1  ;;  %v457_v34 = vadd.f32 %v456_v32, %v455_v30 }
 0x129   : > { %v494_v35 = vadd.f32 %v493_v13, %v492_v33 }
 0x12b   : > { %v496_v36 = vsel %vm495_vm0, %v457_v34, %v494_v35 }
 0x12c   : > { %497 = vst [vmem:[%s197_s11] sm:$0x3] %v496_v36 }
 0x12d PF: > { %s14_s15 = sadd.s32 1, %s713_s15  }
 0x12e   : > { %p11_p5 = scmp.ge.s32.totalorder %s14_s15, 6  }
 0x130   :  { %13 = sbr.rel (!%p11_p5) target bundleno = 1 (0x1), region = 66 }

// kernel: depthwise_separable_conv.5
= control target key start
LH: loop header
LB: loop body
LE: loop exit
PB: predicated region body
PF: predicated region fallthrough
CT: control target
= control target key end

     0   :  { %s830_s21 = smov 0   ;;  %s1022_s0 = inlined_call_operand.vmem [shape: f32[512,128], index: 0, kind: input, shape index: {}]   ;;  %s1023_s1 = inlined_call_operand.vmem [shape: f32[1,128], index: 1, kind: input, shape index: {}]   ;;  %s1024_s2 = inlined_call_operand.vmem [shape: f32[1,128], index: 2, kind: input, shape index: {}]   ;;  %s1025_s3 = inlined_call_operand.vmem [shape: f32[128,128], index: 3, kind: input, shape index: {}]   ;;  %s1026_s4 = inlined_call_operand.vmem [shape: f32[1,128], index: 4, kind: input, shape index: {}]   ;;  %s1027_s5 = inlined_call_operand.vmem [shape: f32[1,128], index: 5, kind: input, shape index: {}]   ;;  %s1028_s6 = inlined_call_operand.vmem [shape: f32[512,128], index: 6, kind: output, shape index: {}]  }
   0x1 LB: > { %s628_s22 = sadd.s32 4294967295, %s793_s21   ;;  %p632_p0 = scmp.ge.s32.totalorder %s793_s21, 1  ;;  %s793_s21 = sphi %s830_s21, %s16_s21  }
   0x2   : > { %p213_p1 = scmp.lt.s32.totalorder %s793_s21, 5 }
   0x4   : > { %p214_p2 = pnand %p632_p0, %p213_p1 }
   0x5   : > { %v333_v0 = vld [vmem:[%s1025_s3] sm:$0xff] (!%p214_p2)  ;;  %v334_v1 = vld [vmem:[%s1025_s3 + $0x8] sm:$0xff] (!%p214_p2)  ;;  %v335_v2 = vld [vmem:[%s1025_s3 + $0x10] sm:$0xff] (!%p214_p2)  ;;  %s633_s29 = sshll.u32 (!%p214_p2), %s628_s22, 4 }
   0x6   : > { %217 = sbr.rel (%p214_p2) target bundleno = 272 (0x110), region = 44  ;;  %v731_v3 = vpack.c.bf16 (!%p214_p2), %v334_v1, %v333_v0  ;;  %v336_v4 = vld [vmem:[%s1025_s3 + $0x18] sm:$0xff] (!%p214_p2)  ;;  %p244_p3 = scmp.lt.s32.totalorder (!%p214_p2), %s633_s29, 63  ;;  %v337_v6 = vld [vmem:[%s1025_s3 + $0x20] sm:$0xff] (!%p214_p2)  ;;  %v338_v7 = vld [vmem:[%s1025_s3 + $0x28] sm:$0xff] (!%p214_p2) }
   0x7   : > { %v735_v5 = vpack.c.bf16 (!%p214_p2), %v336_v4, %v335_v2  ;;  %v739_v8 = vpack.c.bf16 (!%p214_p2), %v338_v7, %v337_v6  ;;  %v862_v9 = vld [vmem:[%s1023_s1] ss:$0 sm:$0xff] (!%p214_p2)  ;;  %v339_v10 = vld [vmem:[%s1025_s3 + $0x30] sm:$0xff] (!%p214_p2)  ;;  %v340_v11 = vld [vmem:[%s1025_s3 + $0x38] sm:$0xff] (!%p214_p2) }
   0x8   : > { %732 = vmatprep.subr.bf16.mxu0 (!%p214_p2), %v731_v3  ;;  %763 = vmatprep.subr.bf16.mxu1 (!%p214_p2), %v731_v3  ;;  %v881_v13 = vld [vmem:[%s1024_s2] ss:$0 sm:$0xff] (!%p214_p2)  ;;  %v743_v17 = vpack.c.bf16 (!%p214_p2), %v340_v11, %v339_v10  ;;  %v342_v19 = vld [vmem:[%s1025_s3 + $0x48] sm:$0xff] (!%p214_p2)  ;;  %v343_v25 = vld [vmem:[%s1025_s3 + $0x50] sm:$0xff] (!%p214_p2) }
   0x9   : > { %734 = vmatpush3.bf16.msra.mxu0 (!%p214_p2), %v731_v3  ;;  %771 = vmatpush3.bf16.msra.mxu1 (!%p214_p2), %v731_v3  ;;  %v341_v18 = vld [vmem:[%s1025_s3 + $0x40] sm:$0xff] (!%p214_p2)  ;;  %v344_v26 = vld [vmem:[%s1025_s3 + $0x58] sm:$0xff] (!%p214_p2)  ;;  %v346_v29 = vld [vmem:[%s1025_s3 + $0x68] sm:$0xff] (!%p214_p2) }
   0xa   : > { %736 = vmatprep.subr.bf16.mxu0 (!%p214_p2), %v735_v5  ;;  %764 = vmatprep.subr.bf16.mxu1 (!%p214_p2), %v735_v5  ;;  %v747_v24 = vpack.c.bf16 (!%p214_p2), %v342_v19, %v341_v18  ;;  %v751_v27 = vpack.c.bf16 (!%p214_p2), %v344_v26, %v343_v25  ;;  %v345_v28 = vld [vmem:[%s1025_s3 + $0x60] sm:$0xff] (!%p214_p2)  ;;  %v347_v35 = vld [vmem:[%s1025_s3 + $0x70] sm:$0xff] (!%p214_p2)  ;;  %v348_v36 = vld [vmem:[%s1025_s3 + $0x78] sm:$0xff] (!%p214_p2) }
   0xb   : > { %v755_v33 = vpack.c.bf16 (!%p214_p2), %v346_v29, %v345_v28  ;;  %v759_v43 = vpack.c.bf16 (!%p214_p2), %v348_v36, %v347_v35 }
   0xd   : > { %s1030_s29 = smov (!%p244_p3, %s633_s29), 63  ;;  %738 = vmatpush3.bf16.msra.mxu0 %v735_v5  ;;  %772 = vmatpush3.bf16.msra.mxu1 %v735_v5 }
   0xe   : > { %s634_s12 = sshll.u32 %s1030_s29, 3  ;;  %740 = vmatprep.subr.bf16.mxu0 %v739_v8  ;;  %765 = vmatprep.subr.bf16.mxu1 %v739_v8 }
   0xf   : > { %s875_s22 = scalar_lea.vmem %s1022_s0, %s634_s12  ;;  %s975_s26 = scalar_lea.vmem %s1028_s6, %s634_s12 }
  0x10   : > { %v255_v12 = vld [vmem:[%s875_s22] sm:$0xff]  ;;  %v256_v30 = vld [vmem:[%s875_s22 + $0x8] sm:$0xff]  ;;  %v257_v32 = vld [vmem:[%s875_s22 + $0x10] sm:$0xff] }
  0x11   : > { %v263_v14 = vld [vmem:[%s875_s22 + $0x40] sm:$0xff]  ;;  %v278_v15 = vmul.f32 %v862_v9, %v255_v12  ;;  %742 = vmatpush3.bf16.msra.mxu0 %v739_v8  ;;  %773 = vmatpush3.bf16.msra.mxu1 %v739_v8  ;;  %v264_v31 = vld [vmem:[%s875_s22 + $0x48] sm:$0xff]  ;;  %v265_v34 = vld [vmem:[%s875_s22 + $0x50] sm:$0xff]  ;;  %v279_v37 = vmul.f32 %v862_v9, %v256_v30  ;;  %v280_v39 = vmul.f32 %v862_v9, %v257_v32 }
  0x12   : > { %v286_v16 = vmul.f32 %v862_v9, %v263_v14  ;;  %744 = vmatprep.subr.bf16.mxu0 %v743_v17  ;;  %766 = vmatprep.subr.bf16.mxu1 %v743_v17  ;;  %v287_v38 = vmul.f32 %v862_v9, %v264_v31  ;;  %v258_v40 = vld [vmem:[%s875_s22 + $0x18] sm:$0xff]  ;;  %v288_v41 = vmul.f32 %v862_v9, %v265_v34  ;;  %v259_v44 = vld [vmem:[%s875_s22 + $0x20] sm:$0xff]  ;;  %v260_v51 = vld [vmem:[%s875_s22 + $0x28] sm:$0xff] }
  0x13   : > { %v301_v20 = vadd.f32 %v881_v13, %v278_v15  ;;  %v266_v42 = vld [vmem:[%s875_s22 + $0x58] sm:$0xff]  ;;  %v267_v45 = vld [vmem:[%s875_s22 + $0x60] sm:$0xff]  ;;  %v302_v46 = vadd.f32 %v881_v13, %v279_v37  ;;  %v281_v48 = vmul.f32 %v862_v9, %v258_v40  ;;  %v303_v49 = vadd.f32 %v881_v13, %v280_v39  ;;  %v268_v55 = vld [vmem:[%s875_s22 + $0x68] sm:$0xff] }
  0x14   : > { %v309_v21 = vadd.f32 %v881_v13, %v286_v16  ;;  %v310_v47 = vadd.f32 %v881_v13, %v287_v38  ;;  %v289_v50 = vmul.f32 %v862_v9, %v266_v42  ;;  %v311_v52 = vadd.f32 %v881_v13, %v288_v41  ;;  %v261_v56 = vld [vmem:[%s875_s22 + $0x30] sm:$0xff]  ;;  %v262_v6 = vld [vmem:[%s875_s22 + $0x38] sm:$0xff] }
  0x15   : > { %v317_v22 = vmax.f32 %v301_v20, 0.0  ;;  %746 = vmatpush3.bf16.msra.mxu0 %v743_v17  ;;  %774 = vmatpush3.bf16.msra.mxu1 %v743_v17  ;;  %v282_v53 = vmul.f32 %v862_v9, %v259_v44  ;;  %v290_v54 = vmul.f32 %v862_v9, %v267_v45  ;;  %v269_v57 = vld [vmem:[%s875_s22 + $0x70] sm:$0xff]  ;;  %v318_v58 = vmax.f32 %v302_v46, 0.0  ;;  %v270_v7 = vld [vmem:[%s875_s22 + $0x78] sm:$0xff] }
  0x16   : > { %v325_v23 = vmax.f32 %v309_v21, 0.0  ;;  %748 = vmatprep.subr.bf16.mxu0 %v747_v24  ;;  %767 = vmatprep.subr.bf16.mxu1 %v747_v24  ;;  %v326_v59 = vmax.f32 %v310_v47, 0.0  ;;  %v304_v60 = vadd.f32 %v881_v13, %v281_v48  ;;  %v283_v61 = vmul.f32 %v862_v9, %v260_v51 }
  0x17   : > { %707 = vmatprep.mubr.f32.mxu0 %v317_v22  ;;  %v319_v62 = vmax.f32 %v303_v49, 0.0  ;;  %v312_v63 = vadd.f32 %v881_v13, %v289_v50  ;;  %v291_v0 = vmul.f32 %v862_v9, %v268_v55  ;;  %v284_v1 = vmul.f32 %v862_v9, %v261_v56 }
  0x18   : > { %719 = vmatprep.mubr.f32.mxu1 %v325_v23  ;;  %v327_v2 = vmax.f32 %v311_v52, 0.0  ;;  %v305_v3 = vadd.f32 %v881_v13, %v282_v53  ;;  %v313_v4 = vadd.f32 %v881_v13, %v290_v54  ;;  %v292_v5 = vmul.f32 %v862_v9, %v269_v57 }
  0x19   : > { %750 = vmatpush3.bf16.msra.mxu0 %v747_v24  ;;  %775 = vmatpush3.bf16.msra.mxu1 %v747_v24  ;;  %v320_v8 = vmax.f32 %v304_v60, 0.0  ;;  %v306_v10 = vadd.f32 %v881_v13, %v283_v61  ;;  %v328_v11 = vmax.f32 %v312_v63, 0.0  ;;  %v314_v12 = vadd.f32 %v881_v13, %v291_v0 }
  0x1a   : > { %752 = vmatprep.subr.bf16.mxu0 %v751_v27  ;;  %768 = vmatprep.subr.bf16.mxu1 %v751_v27  ;;  %v285_v14 = vmul.f32 %v862_v9, %v262_v6  ;;  %v293_v15 = vmul.f32 %v862_v9, %v270_v7  ;;  %v321_v16 = vmax.f32 %v305_v3, 0.0  ;;  %v329_v17 = vmax.f32 %v313_v4, 0.0 }
  0x1b   : > { %v307_v18 = vadd.f32 %v881_v13, %v284_v1  ;;  %v315_v19 = vadd.f32 %v881_v13, %v292_v5  ;;  %v322_v20 = vmax.f32 %v306_v10, 0.0  ;;  %v330_v21 = vmax.f32 %v314_v12, 0.0 }
  0x1c   : > { %v308_v22 = vadd.f32 %v881_v13, %v285_v14  ;;  %v316_v23 = vadd.f32 %v881_v13, %v293_v15  ;;  %v962_v13 = vld [vmem:[%s1027_s5] ss:$0 sm:$0xff] }
  0x1d   : > { %754 = vmatpush3.bf16.msra.mxu0 %v751_v27  ;;  %776 = vmatpush3.bf16.msra.mxu1 %v751_v27  ;;  %v323_v24 = vmax.f32 %v307_v18, 0.0  ;;  %v331_v9 = vmax.f32 %v315_v19, 0.0  ;;  %v957_v27 = vld [vmem:[%s1026_s4] ss:$0 sm:$0xff] }
  0x1e   : > { %756 = vmatprep.subr.bf16.mxu0 %v755_v33  ;;  %769 = vmatprep.subr.bf16.mxu1 %v755_v33  ;;  %v324_v25 = vmax.f32 %v308_v22, 0.0  ;;  %v332_v26 = vmax.f32 %v316_v23, 0.0 }
  0x21   : > { %758 = vmatpush3.bf16.msra.mxu0 %v755_v33  ;;  %777 = vmatpush3.bf16.msra.mxu1 %v755_v33 }
  0x22   : > { %760 = vmatprep.subr.bf16.mxu0 %v759_v43  ;;  %770 = vmatprep.subr.bf16.mxu1 %v759_v43 }
  0x25   : > { %762 = vmatpush3.bf16.msra.mxu0 %v759_v43  ;;  %778 = vmatpush3.bf16.msra.mxu1 %v759_v43 }
  0x28   : > { %708 = vmatmul.mubr.f32.vlgmr.msra.gmra.mrb[0].mxu0 %v318_v58  ;;  %720 = vmatmul.mubr.f32.vlgmr.msra.gmra.mrb[0].mxu1 %v326_v59 }
  0x29   : > { %710 = vmatprep.mubr.f32.mxu0 %v319_v62  ;;  %722 = vmatprep.mubr.f32.mxu1 %v327_v2 }
  0x2c   : > { %711 = vmatmul.mubr.f32.gmra.mrb[2].mxu0 %v320_v8  ;;  %723 = vmatmul.mubr.f32.gmra.mrb[2].mxu1 %v328_v11 }
  0x2d   : > { %713 = vmatprep.mubr.f32.mxu0 %v321_v16  ;;  %725 = vmatprep.mubr.f32.mxu1 %v329_v17 }
  0x30   : > { %714 = vmatmul.mubr.f32.gmra.mrb[4].mxu0 %v322_v20  ;;  %726 = vmatmul.mubr.f32.gmra.mrb[4].mxu1 %v330_v21 }
  0x31   : > { %716 = vmatprep.mubr.f32.mxu0 %v323_v24  ;;  %728 = vmatprep.mubr.f32.mxu1 %v331_v9 }
  0x34   : > { %717 = vmatmul.mubr.f32.gmra.mrb[6].mxu0 %v324_v25  ;;  %729 = vmatmul.mubr.f32.gmra.mrb[6].mxu1 %v332_v26 }
  0xfb   : > { %v709_v28 = vpop.f32.mrb[0].mxu0  ;;  %v721_v29 = vpop.f32.mrb[0].mxu1 }
  0xfc   : > { %v502_v30 = vmul.f32 %v709_v28, %v957_v27  ;;  %v510_v31 = vmul.f32 %v721_v29, %v957_v27  ;;  %v415_v32 = vpop.f32.mrb[1].mxu0  ;;  %v455_v33 = vpop.f32.mrb[1].mxu1 }
  0xfd   : > { %v501_v34 = vmul.f32 %v957_v27, %v415_v32  ;;  %v509_v35 = vmul.f32 %v957_v27, %v455_v33 }
  0xfe   : > { %v525_v36 = vadd.f32 %v962_v13, %v502_v30  ;;  %v533_v37 = vadd.f32 %v962_v13, %v510_v31 }
  0xff   : > { %v524_v38 = vadd.f32 %v962_v13, %v501_v34  ;;  %v532_v39 = vadd.f32 %v962_v13, %v509_v35  ;;  %v712_v40 = vpop.f32.mrb[2].mxu0  ;;  %v724_v41 = vpop.f32.mrb[2].mxu1 }
 0x100   : > { %v541_v42 = vmax.f32 %v525_v36, 0.0  ;;  %v549_v43 = vmax.f32 %v533_v37, 0.0  ;;  %v504_v44 = vmul.f32 %v712_v40, %v957_v27  ;;  %v512_v45 = vmul.f32 %v724_v41, %v957_v27  ;;  %v425_v46 = vpop.f32.mrb[3].mxu0  ;;  %v465_v47 = vpop.f32.mrb[3].mxu1 }
 0x101   : > { %v540_v48 = vmax.f32 %v524_v38, 0.0  ;;  %v548_v49 = vmax.f32 %v532_v39, 0.0  ;;  %v503_v50 = vmul.f32 %v957_v27, %v425_v46  ;;  %v511_v51 = vmul.f32 %v957_v27, %v465_v47 }
 0x102   : > { %557 = vst [vmem:[%s975_s26 + $0x8] sm:$0xff] %v541_v42  ;;  %565 = vst [vmem:[%s975_s26 + $0x48] sm:$0xff] %v549_v43  ;;  %v527_v52 = vadd.f32 %v962_v13, %v504_v44  ;;  %v535_v53 = vadd.f32 %v962_v13, %v512_v45 }
 0x103   : > { %556 = vst [vmem:[%s975_s26] sm:$0xff] %v540_v48  ;;  %564 = vst [vmem:[%s975_s26 + $0x40] sm:$0xff] %v548_v49  ;;  %v526_v54 = vadd.f32 %v962_v13, %v503_v50  ;;  %v534_v55 = vadd.f32 %v962_v13, %v511_v51  ;;  %v715_v56 = vpop.f32.mrb[4].mxu0  ;;  %v727_v57 = vpop.f32.mrb[4].mxu1 }
 0x104   : > { %v543_v58 = vmax.f32 %v527_v52, 0.0  ;;  %v551_v59 = vmax.f32 %v535_v53, 0.0  ;;  %v506_v60 = vmul.f32 %v715_v56, %v957_v27  ;;  %v514_v61 = vmul.f32 %v727_v57, %v957_v27  ;;  %v435_v62 = vpop.f32.mrb[5].mxu0  ;;  %v475_v63 = vpop.f32.mrb[5].mxu1 }
 0x105   : > { %v542_v0 = vmax.f32 %v526_v54, 0.0  ;;  %v550_v1 = vmax.f32 %v534_v55, 0.0  ;;  %v505_v2 = vmul.f32 %v957_v27, %v435_v62  ;;  %v513_v3 = vmul.f32 %v957_v27, %v475_v63 }
 0x106   : > { %559 = vst [vmem:[%s975_s26 + $0x18] sm:$0xff] %v543_v58  ;;  %567 = vst [vmem:[%s975_s26 + $0x58] sm:$0xff] %v551_v59  ;;  %v529_v4 = vadd.f32 %v962_v13, %v506_v60  ;;  %v537_v5 = vadd.f32 %v962_v13, %v514_v61 }
 0x107   : > { %558 = vst [vmem:[%s975_s26 + $0x10] sm:$0xff] %v542_v0  ;;  %566 = vst [vmem:[%s975_s26 + $0x50] sm:$0xff] %v550_v1  ;;  %v528_v6 = vadd.f32 %v962_v13, %v505_v2  ;;  %v536_v7 = vadd.f32 %v962_v13, %v513_v3  ;;  %v718_v8 = vpop.f32.mrb[6].mxu0  ;;  %v730_v10 = vpop.f32.mrb[6].mxu1 }
 0x108   : > { %v545_v11 = vmax.f32 %v529_v4, 0.0  ;;  %v553_v12 = vmax.f32 %v537_v5, 0.0  ;;  %v508_v14 = vmul.f32 %v718_v8, %v957_v27  ;;  %v516_v15 = vmul.f32 %v730_v10, %v957_v27  ;;  %v445_v16 = vpop.f32.mrb[7].mxu0  ;;  %v485_v17 = vpop.f32.mrb[7].mxu1 }
 0x109   : > { %v544_v18 = vmax.f32 %v528_v6, 0.0  ;;  %v552_v19 = vmax.f32 %v536_v7, 0.0  ;;  %v507_v20 = vmul.f32 %v957_v27, %v445_v16  ;;  %v515_v21 = vmul.f32 %v957_v27, %v485_v17 }
 0x10a   : > { %561 = vst [vmem:[%s975_s26 + $0x28] sm:$0xff] %v545_v11  ;;  %569 = vst [vmem:[%s975_s26 + $0x68] sm:$0xff] %v553_v12  ;;  %v531_v22 = vadd.f32 %v962_v13, %v508_v14  ;;  %v539_v23 = vadd.f32 %v962_v13, %v516_v15 }
 0x10b   : > { %560 = vst [vmem:[%s975_s26 + $0x20] sm:$0xff] %v544_v18  ;;  %568 = vst [vmem:[%s975_s26 + $0x60] sm:$0xff] %v552_v19  ;;  %v530_v24 = vadd.f32 %v962_v13, %v507_v20  ;;  %v538_v9 = vadd.f32 %v962_v13, %v515_v21 }
 0x10c   : > { %v547_v25 = vmax.f32 %v531_v22, 0.0  ;;  %v555_v26 = vmax.f32 %v539_v23, 0.0 }
 0x10d   : > { %v546_v28 = vmax.f32 %v530_v24, 0.0  ;;  %v554_v29 = vmax.f32 %v538_v9, 0.0 }
 0x10e   : > { %563 = vst [vmem:[%s975_s26 + $0x38] sm:$0xff] %v547_v25  ;;  %571 = vst [vmem:[%s975_s26 + $0x78] sm:$0xff] %v555_v26 }
 0x10f   : > { %562 = vst [vmem:[%s975_s26 + $0x30] sm:$0xff] %v546_v28  ;;  %570 = vst [vmem:[%s975_s26 + $0x70] sm:$0xff] %v554_v29 }
 0x110 PF: > { %s16_s21 = sadd.s32 1, %s793_s21  }
 0x111   : > { %p13_p4 = scmp.ge.s32.totalorder %s16_s21, 6  }
 0x113   :  { %15 = sbr.rel (!%p13_p4) target bundleno = 1 (0x1), region = 74 }

// kernel: depthwise_separable_conv.3
= control target key start
LH: loop header
LB: loop body
LE: loop exit
PB: predicated region body
PF: predicated region fallthrough
CT: control target
= control target key end

     0   :  { %s1452_s12 = smov 0   ;;  %s1454_s13 = smov 0   ;;  %s2589_s0 = inlined_call_operand.vmem [shape: f32[2,432,128], index: 0, kind: input, shape index: {}]   ;;  %s2590_s1 = inlined_call_operand.vmem [shape: f32[9,128], index: 1, kind: input, shape index: {}]   ;;  %s2591_s2 = inlined_call_operand.vmem [shape: f32[512,128], index: 2, kind: output, shape index: {0}]   ;;  %s2592_s3 = inlined_call_operand.vmem [shape: f32[2,1,2,128], index: 3, kind: output, shape index: {1}]  }
   0x1   :  { %s1456_s14 = smov 0  }
   0x2 LB: > { %s26_s15 = sadd.s32 1, %s1426_s13  ;;  %p1374_p0 = scmp.ge.s32.totalorder %s1430_s14, 1  ;;  %s1430_s14 = sphi %s1456_s14, %s14_s14   ;;  %s1426_s13 = sphi %s1454_s13, %s2595_s13   ;;  %s1422_s12 = sphi %s1452_s12, %s2594_s12  }
   0x3   : > { %p28_p1 = scmp.ge.s32.totalorder %s26_s15, 2  ;;  %p170_p2 = scmp.lt.s32.totalorder %s1430_s14, 3 }
   0x5   : > { %s2597_s15 = smov (%p28_p1, %s26_s15), 0  ;;  %p171_p3 = pnand %p1374_p0, %p170_p2 }
   0x6   : > { %p211_p4 = scmp.lt.s32.totalorder (!%p171_p3), %s1422_s12, 1  ;;  %v295_v0 = vlaneseq (!%p171_p3)  ;;  %v293_v2 = vld [vmem:[%s2590_s1] sm:$0xff] (!%p171_p3)  ;;  %s1376_s23 = sshll.u32 (!%p171_p3), %s1422_s12, 5  ;;  %v1597_v61 = vld [vmem:[%s2590_s1 + $0x8] ss:$0 sm:$0xff] (!%p171_p3)  ;;  %vm1229_vm2 = vcmask (!%p171_p3), 1040384  }
   0x7   : > { %174 = sbr.rel (%p171_p3) target bundleno = 249 (0xf9), region = 28  ;;  %p1547_p5 = scmp.lt.s32.totalorder (!%p171_p3), %s1376_s23, 63 }
   0x8   : > { %v1476_v1 = vshrl.u32 (!%p171_p3), %v295_v0, 7 }
   0xa   : > { %v297_v3 = vsub.s32 (!%p171_p3), 0, %v1476_v1  ;;  %v365_v4 = vsub.s32 (!%p171_p3), 3, %v1476_v1  ;;  %v433_v5 = vsub.s32 (!%p171_p3), 6, %v1476_v1  ;;  %vm555_vm0 = vcmp.lt.s32.totalorder (!%p171_p3), %v1476_v1, 7 }
   0xb   : > { %v594_v6 = vsub.s32 (!%p171_p3), 1, %v1476_v1  ;;  %v662_v7 = vsub.s32 (!%p171_p3), 4, %v1476_v1  ;;  %v730_v8 = vsub.s32 (!%p171_p3), 7, %v1476_v1  ;;  %vm850_vm1 = vcmp.lt.s32.totalorder (!%p171_p3), %v1476_v1, 6 }
   0xc   : > { %v1495_v9 = vrot.slane (!%p171_p3), %v293_v2, %v297_v3  ;;  %v1497_v10 = vrot.slane (!%p171_p3), %v293_v2, %v365_v4  ;;  %v1499_v11 = vrot.slane (!%p171_p3), %v293_v2, %v433_v5  ;;  %v889_v12 = vsub.s32 (!%p171_p3), 2, %v1476_v1 }
   0xd   : > { %v1509_v16 = vrot.slane (!%p171_p3), %v293_v2, %v594_v6  ;;  %v1511_v17 = vrot.slane (!%p171_p3), %v293_v2, %v662_v7  ;;  %v1513_v18 = vrot.slane (!%p171_p3), %v293_v2, %v730_v8  ;;  %v957_v19 = vsub.s32 (!%p171_p3), 5, %v1476_v1 }
   0xe   : > { %s1474_s16 = scalar_select %p211_p4, %s1422_s12, 1  ;;  %v1568_v49 = vrot.slane %v293_v2, %v889_v12 }
   0xf   : > { %v1570_v50 = vrot.slane %v293_v2, %v957_v19  ;;  %s2599_s23 = smov (!%p1547_p5, %s1376_s23), 63 }
  0x10   : > { %s1382_s19 = smul.u32 432, %s1474_s16  ;;  %s1377_s27 = sshll.u32 %s2599_s23, 3 }
  0x11   : > { %s1633_s30 = scalar_lea.vmem %s2591_s2, %s1377_s27  ;;  %s1378_s6 = sshll.u32 %s1474_s16, 1 }
  0x12   : > { %s1493_s22 = scalar_lea.vmem %s2589_s0, %s1382_s19  ;;  %s238_s9 = scalar_lea.vmem %s2592_s3, %s1378_s6 }
  0x13   : > { %v239_v13 = vld [vmem:[%s1493_s22] sm:$0xff]  ;;  %v1504_v14 = vld [vmem:[%s1493_s22 + $0x8] sm:$0xff]  ;;  %v1507_v15 = vld [vmem:[%s1493_s22 + $0x18] sm:$0xff] }
  0x14   : > { %v1517_v20 = vld [vmem:[%s1493_s22 + $0x20] sm:$0xff]  ;;  %v1520_v21 = vld [vmem:[%s1493_s22 + $0x30] sm:$0xff]  ;;  %v299_v22 = vmul.f32 %v1495_v9, %v239_v13  ;;  %v367_v23 = vmul.f32 %v1497_v10, %v1507_v15  ;;  %v499_v24 = vrot.slane %v239_v13, 1  ;;  %v500_v25 = vrot.slane %v1504_v14, 1  ;;  %v1528_v26 = vld [vmem:[%s1493_s22 + $0x38] sm:$0xff] }
  0x15   : > { %v435_v27 = vmul.f32 %v1499_v11, %v1520_v21  ;;  %v502_v28 = vrot.slane %v1507_v15, 1  ;;  %v503_v29 = vrot.slane %v1517_v20, 1  ;;  %v505_v30 = vrot.slane %v1520_v21, 1  ;;  %v241_v51 = vld [vmem:[%s1493_s22 + $0x10] sm:$0xff]  ;;  %v244_v52 = vld [vmem:[%s1493_s22 + $0x28] sm:$0xff]  ;;  %v247_v53 = vld [vmem:[%s1493_s22 + $0x40] sm:$0xff] }
  0x16   : > { %v399_v31 = vadd.f32 %v367_v23, %v299_v22  ;;  %v506_v32 = vrot.slane %v1528_v26, 1  ;;  %v591_v33 = vsel %vm555_vm0, %v499_v24, %v500_v25  ;;  %v796_v34 = vrot.slane %v239_v13, 2  ;;  %v1613_v24 = vld [vmem:[%s1493_s22 + $0x48] sm:$0xff] }
  0x17   : > { %v1540_v35 = vsel %vm555_vm0, %v502_v28, %v503_v29  ;;  %v596_v36 = vmul.f32 %v1509_v16, %v591_v33  ;;  %v797_v37 = vrot.slane %v1504_v14, 2  ;;  %v799_v38 = vrot.slane %v1507_v15, 2 }
  0x18   : > { %v467_v39 = vadd.f32 %v435_v27, %v399_v31  ;;  %v1553_v40 = vsel %vm555_vm0, %v505_v30, %v506_v32  ;;  %v664_v41 = vmul.f32 %v1511_v17, %v1540_v35  ;;  %v800_v42 = vrot.slane %v1517_v20, 2 }
  0x19   : > { %v732_v43 = vmul.f32 %v1513_v18, %v1553_v40  ;;  %v802_v44 = vrot.slane %v1520_v21, 2  ;;  %v803_v45 = vrot.slane %v1528_v26, 2  ;;  %v886_v46 = vsel %vm850_vm1, %v796_v34, %v797_v37 }
  0x1a   : > { %v628_v47 = vadd.f32 %v596_v36, %v467_v39  ;;  %v1566_v48 = vsel %vm850_vm1, %v799_v38, %v800_v42  ;;  %v300_v54 = vmul.f32 %v1495_v9, %v1504_v14  ;;  %v368_v55 = vmul.f32 %v1497_v10, %v1517_v20 }
  0x1b   : > { %v436_v56 = vmul.f32 %v1499_v11, %v1528_v26  ;;  %v1589_v58 = vsel %vm850_vm1, %v802_v44, %v803_v45  ;;  %v891_v59 = vmul.f32 %v1568_v49, %v886_v46  ;;  %v959_v60 = vmul.f32 %v1570_v50, %v1566_v48 }
  0x1c   : > { %v696_v57 = vadd.f32 %v664_v41, %v628_v47  ;;  %v400_v62 = vadd.f32 %v368_v55, %v300_v54  ;;  %v501_v63 = vrot.slane %v241_v51, 1  ;;  %v504_v0 = vrot.slane %v244_v52, 1  ;;  %v250_v54 = vld [vmem:[%s1493_s22 + $0x58] sm:$0xff] }
  0x1d   : > { %v507_v2 = vrot.slane %v247_v53, 1  ;;  %v798_v4 = vrot.slane %v241_v51, 2  ;;  %v801_v5 = vrot.slane %v244_v52, 2  ;;  %v804_v6 = vrot.slane %v247_v53, 2 }
  0x1e   : > { %v764_v3 = vadd.f32 %v732_v43, %v696_v57  ;;  %v468_v7 = vadd.f32 %v436_v56, %v400_v62  ;;  %v588_v12 = vsel %vm555_vm0, %v503_v29, %v504_v0  ;;  %v590_v13 = vsel %vm555_vm0, %v500_v25, %v501_v63  ;;  %v1620_v29 = vld [vmem:[%s1493_s22 + $0x50] sm:$0xff] }
  0x1f   : > { %v1601_v8 = vsel %vm555_vm0, %v506_v32, %v507_v2  ;;  %v1027_v19 = vmul.f32 %v1597_v61, %v1589_v58  ;;  %v597_v22 = vmul.f32 %v1509_v16, %v590_v13  ;;  %v665_v23 = vmul.f32 %v1511_v17, %v588_v12 }
  0x20   : > { %v923_v14 = vadd.f32 %v891_v59, %v764_v3  ;;  %v883_v27 = vsel %vm850_vm1, %v800_v42, %v801_v5  ;;  %v885_v28 = vsel %vm850_vm1, %v797_v37, %v798_v4  ;;  %v301_v25 = vmul.f32 %v1495_v9, %v1507_v15 }
  0x21   : > { %v629_v31 = vadd.f32 %v597_v22, %v468_v7  ;;  %v733_v32 = vmul.f32 %v1513_v18, %v1601_v8  ;;  %v1628_v33 = vsel %vm850_vm1, %v803_v45, %v804_v6  ;;  %v892_v34 = vmul.f32 %v1568_v49, %v885_v28  ;;  %v1683_v22 = vld [vmem:[%s1493_s22 + $0x60] sm:$0xff] }
  0x22   : > { %v991_v30 = vadd.f32 %v959_v60, %v923_v14  ;;  %v369_v15 = vmul.f32 %v1497_v10, %v1520_v21  ;;  %v437_v36 = vmul.f32 %v1499_v11, %v1613_v24  ;;  %v508_v37 = vrot.slane %v1613_v24, 1 }
  0x23   : > { %v697_v39 = vadd.f32 %v665_v23, %v629_v31  ;;  %v960_v41 = vmul.f32 %v1570_v50, %v883_v27  ;;  %v509_v42 = vrot.slane %v1620_v29, 1  ;;  %v598_v44 = vmul.f32 %v1509_v16, %v1540_v35 }
  0x24   : > { %v1059_v38 = vadd.f32 %v1027_v19, %v991_v30  ;;  %v401_v43 = vadd.f32 %v369_v15, %v301_v25  ;;  %v805_v45 = vrot.slane %v1613_v24, 2  ;;  %v806_v46 = vrot.slane %v1620_v29, 2  ;;  %v1689_v30 = vld [vmem:[%s1493_s22 + $0x68] sm:$0xff] }
  0x25   : > { %v765_v47 = vadd.f32 %v733_v32, %v697_v39  ;;  %v1028_v51 = vmul.f32 %v1597_v61, %v1628_v33  ;;  %v1652_v52 = vsel %vm555_vm0, %v508_v37, %v509_v42  ;;  %v666_v53 = vmul.f32 %v1511_v17, %v1553_v40 }
  0x26   : > { %1091 = vst [vmem:[%s1633_s30] sm:$0xff] %v1059_v38  ;;  %v1160_v55 = vmul.f32 %v1059_v38, %v1059_v38  ;;  %v469_v56 = vadd.f32 %v437_v36, %v401_v43  ;;  %v734_v35 = vmul.f32 %v1513_v18, %v1652_v52  ;;  %v893_v57 = vmul.f32 %v1568_v49, %v1566_v48 }
  0x27   : > { %v924_v59 = vadd.f32 %v892_v34, %v765_v47  ;;  %v1663_v60 = vsel %vm850_vm1, %v805_v45, %v806_v46  ;;  %v302_v62 = vmul.f32 %v1495_v9, %v1517_v20  ;;  %v370_v63 = vmul.f32 %v1497_v10, %v1528_v26 }
  0x28   : > { %v630_v0 = vadd.f32 %v598_v44, %v469_v56  ;;  %v961_v2 = vmul.f32 %v1570_v50, %v1589_v58  ;;  %v438_v48 = vmul.f32 %v1499_v11, %v1620_v29  ;;  %v510_v3 = vrot.slane %v250_v54, 1 }
  0x29   : > { %v992_v4 = vadd.f32 %v960_v41, %v924_v59  ;;  %v402_v5 = vadd.f32 %v370_v63, %v302_v62  ;;  %v599_v6 = vmul.f32 %v1509_v16, %v588_v12  ;;  %v807_v7 = vrot.slane %v250_v54, 2  ;;  %v253_v63 = vld [vmem:[%s1493_s22 + $0x70] sm:$0xff] }
  0x2a   : > { %v698_v13 = vadd.f32 %v666_v53, %v630_v0  ;;  %v1029_v20 = vmul.f32 %v1597_v61, %v1663_v60  ;;  %v1678_v14 = vsel %vm555_vm0, %v509_v42, %v510_v3  ;;  %v667_v19 = vmul.f32 %v1511_v17, %v1601_v8 }
  0x2b   : > { %v1060_v23 = vadd.f32 %v1028_v51, %v992_v4  ;;  %v470_v28 = vadd.f32 %v438_v48, %v402_v5  ;;  %v735_v12 = vmul.f32 %v1513_v18, %v1678_v14  ;;  %v894_v25 = vmul.f32 %v1568_v49, %v883_v27 }
  0x2c   : > { %v766_v31 = vadd.f32 %v734_v35, %v698_v13  ;;  %v1693_v32 = vsel %vm850_vm1, %v806_v46, %v807_v7  ;;  %v303_v34 = vmul.f32 %v1495_v9, %v1520_v21  ;;  %v371_v15 = vmul.f32 %v1497_v10, %v1613_v24 }
  0x2d   : > { %1092 = vst [vmem:[%s1633_s30 + $0x8] sm:$0xff] %v1060_v23  ;;  %v1123_v36 = vadd.f32 %v1060_v23, %v1059_v38  ;;  %v1161_v37 = vmul.f32 %v1060_v23, %v1060_v23  ;;  %v631_v39 = vadd.f32 %v599_v6, %v470_v28  ;;  %v439_v27 = vmul.f32 %v1499_v11, %v1683_v22 }
  0x2e   : > { %v925_v41 = vadd.f32 %v893_v57, %v766_v31  ;;  %v403_v42 = vadd.f32 %v371_v15, %v303_v34  ;;  %v511_v43 = vrot.slane %v1683_v22, 1  ;;  %v512_v44 = vrot.slane %v1689_v30, 1 }
  0x2f   : > { %v1192_v45 = vadd.f32 %v1161_v37, %v1160_v55  ;;  %v699_v46 = vadd.f32 %v667_v19, %v631_v39  ;;  %v600_v21 = vmul.f32 %v1509_v16, %v1553_v40  ;;  %v668_v38 = vmul.f32 %v1511_v17, %v1652_v52  ;;  %v1745_v37 = vld [vmem:[%s1493_s22 + $0x78] sm:$0xff] }
  0x30   : > { %v993_v47 = vadd.f32 %v961_v2, %v925_v41  ;;  %v471_v51 = vadd.f32 %v439_v27, %v403_v42  ;;  %v1710_v53 = vsel %vm555_vm0, %v511_v43, %v512_v44  ;;  %v808_v54 = vrot.slane %v1683_v22, 2  ;;  %v1754_v42 = vld [vmem:[%s1493_s22 + $0x80] sm:$0xff] }
  0x31   : > { %v767_v56 = vadd.f32 %v735_v12, %v699_v46  ;;  %v962_v55 = vmul.f32 %v1570_v50, %v1628_v33  ;;  %v1030_v35 = vmul.f32 %v1597_v61, %v1693_v32  ;;  %v809_v40 = vrot.slane %v1689_v30, 2 }
  0x32   : > { %v1061_v57 = vadd.f32 %v1029_v20, %v993_v47  ;;  %v632_v59 = vadd.f32 %v600_v21, %v471_v51  ;;  %v736_v62 = vmul.f32 %v1513_v18, %v1710_v53  ;;  %v304_v0 = vmul.f32 %v1495_v9, %v1528_v26 }
  0x33   : > { %v926_v2 = vadd.f32 %v894_v25, %v767_v56  ;;  %v895_v48 = vmul.f32 %v1568_v49, %v1589_v58  ;;  %v372_v3 = vmul.f32 %v1497_v10, %v1620_v29  ;;  %v440_v4 = vmul.f32 %v1499_v11, %v1689_v30 }
  0x34   : > { %1093 = vst [vmem:[%s1633_s30 + $0x10] sm:$0xff] %v1061_v57  ;;  %v1124_v5 = vadd.f32 %v1123_v36, %v1061_v57  ;;  %v1162_v6 = vmul.f32 %v1061_v57, %v1061_v57  ;;  %v700_v7 = vadd.f32 %v668_v38, %v632_v59  ;;  %v1732_v13 = vsel %vm850_vm1, %v808_v54, %v809_v40 }
  0x35   : > { %v994_v26 = vadd.f32 %v962_v55, %v926_v2  ;;  %v404_v20 = vadd.f32 %v372_v3, %v304_v0  ;;  %v513_v19 = vrot.slane %v253_v63, 1  ;;  %v601_v58 = vmul.f32 %v1509_v16, %v1601_v8 }
  0x36   : > { %v1193_v23 = vadd.f32 %v1192_v45, %v1162_v6  ;;  %v768_v28 = vadd.f32 %v736_v62, %v700_v7  ;;  %v963_v12 = vmul.f32 %v1570_v50, %v1663_v60  ;;  %v810_v25 = vrot.slane %v253_v63, 2 }
  0x37   : > { %v1062_v31 = vadd.f32 %v1030_v35, %v994_v26  ;;  %v472_v34 = vadd.f32 %v440_v4, %v404_v20  ;;  %v1740_v15 = vsel %vm555_vm0, %v512_v44, %v513_v19  ;;  %v669_v36 = vmul.f32 %v1511_v17, %v1678_v14 }
  0x38   : > { %v927_v39 = vadd.f32 %v895_v48, %v768_v28  ;;  %v1031_v8 = vmul.f32 %v1597_v61, %v1732_v13  ;;  %v737_v27 = vmul.f32 %v1513_v18, %v1740_v15  ;;  %v896_v41 = vmul.f32 %v1568_v49, %v1628_v33 }
  0x39   : > { %1094 = vst [vmem:[%s1633_s30 + $0x18] sm:$0xff] %v1062_v31  ;;  %v1125_v43 = vadd.f32 %v1124_v5, %v1062_v31  ;;  %v1163_v44 = vmul.f32 %v1062_v31, %v1062_v31  ;;  %v633_v45 = vadd.f32 %v601_v58, %v472_v34  ;;  %v1759_v46 = vsel %vm850_vm1, %v809_v40, %v810_v25  ;;  %v256_v5 = vld [vmem:[%s1493_s22 + $0x88] sm:$0xff] }
  0x3a   : > { %v995_v21 = vadd.f32 %v963_v12, %v927_v39  ;;  %v305_v38 = vmul.f32 %v1495_v9, %v1613_v24  ;;  %v373_v47 = vmul.f32 %v1497_v10, %v1683_v22  ;;  %v441_v33 = vmul.f32 %v1499_v11, %v1745_v37 }
  0x3b   : > { %v1194_v51 = vadd.f32 %v1193_v23, %v1163_v44  ;;  %v701_v54 = vadd.f32 %v669_v36, %v633_v45  ;;  %v514_v56 = vrot.slane %v1745_v37, 1  ;;  %v515_v55 = vrot.slane %v1754_v42, 1 }
  0x3c   : > { %v1063_v35 = vadd.f32 %v1031_v8, %v995_v21  ;;  %v964_v40 = vmul.f32 %v1570_v50, %v1693_v32  ;;  %v405_v57 = vadd.f32 %v373_v47, %v305_v38  ;;  %v602_v24 = vmul.f32 %v1509_v16, %v1652_v52  ;;  %v1819_v47 = vld [vmem:[%s1493_s22 + $0x98] sm:$0xff] }
  0x3d   : > { %v769_v59 = vadd.f32 %v737_v27, %v701_v54  ;;  %v1775_v62 = vsel %vm555_vm0, %v514_v56, %v515_v55  ;;  %v811_v63 = vrot.slane %v1745_v37, 2  ;;  %v812_v0 = vrot.slane %v1754_v42, 2 }
  0x3e   : > { %1095 = vst [vmem:[%s1633_s30 + $0x20] sm:$0xff] %v1063_v35  ;;  %v1126_v2 = vadd.f32 %v1125_v43, %v1063_v35  ;;  %v1164_v48 = vmul.f32 %v1063_v35, %v1063_v35  ;;  %v473_v3 = vadd.f32 %v441_v33, %v405_v57  ;;  %v670_v4 = vmul.f32 %v1511_v17, %v1710_v53  ;;  %v1810_v43 = vld [vmem:[%s1493_s22 + $0x90] sm:$0xff] }
  0x3f   : > { %v928_v6 = vadd.f32 %v896_v41, %v769_v59  ;;  %v1032_v52 = vmul.f32 %v1597_v61, %v1759_v46  ;;  %v738_v7 = vmul.f32 %v1513_v18, %v1775_v62  ;;  %v1789_v26 = vsel %vm850_vm1, %v811_v63, %v812_v0 }
  0x40   : > { %v1195_v20 = vadd.f32 %v1194_v51, %v1164_v48  ;;  %v634_v19 = vadd.f32 %v602_v24, %v473_v3  ;;  %v897_v58 = vmul.f32 %v1568_v49, %v1663_v60  ;;  %v306_v23 = vmul.f32 %v1495_v9, %v1620_v29 }
  0x41   : > { %v996_v28 = vadd.f32 %v964_v40, %v928_v6  ;;  %v374_v12 = vmul.f32 %v1497_v10, %v1689_v30  ;;  %v442_v25 = vmul.f32 %v1499_v11, %v1754_v42  ;;  %v516_v31 = vrot.slane %v256_v5, 1 }
  0x42   : > { %v702_v34 = vadd.f32 %v670_v4, %v634_v19  ;;  %v965_v36 = vmul.f32 %v1570_v50, %v1732_v13  ;;  %v1033_v60 = vmul.f32 %v1597_v61, %v1789_v26  ;;  %v813_v39 = vrot.slane %v256_v5, 2  ;;  %v259_v19 = vld [vmem:[%s1493_s22 + $0xa0] sm:$0xff] }
  0x43   : > { %v1064_v8 = vadd.f32 %v1032_v52, %v996_v28  ;;  %v406_v29 = vadd.f32 %v374_v12, %v306_v23  ;;  %v1805_v27 = vsel %vm555_vm0, %v515_v55, %v516_v31  ;;  %v603_v41 = vmul.f32 %v1509_v16, %v1678_v14 }
  0x44   : > { %v770_v44 = vadd.f32 %v738_v7, %v702_v34  ;;  %v671_v45 = vmul.f32 %v1511_v17, %v1740_v15  ;;  %v739_v21 = vmul.f32 %v1513_v18, %v1805_v27  ;;  %v898_v38 = vmul.f32 %v1568_v49, %v1693_v32 }
  0x45   : > { %1096 = vst [vmem:[%s1633_s30 + $0x28] sm:$0xff] %v1064_v8  ;;  %v1127_v33 = vadd.f32 %v1126_v2, %v1064_v8  ;;  %v1165_v51 = vmul.f32 %v1064_v8, %v1064_v8  ;;  %v474_v54 = vadd.f32 %v442_v25, %v406_v29  ;;  %v1824_v14 = vsel %vm850_vm1, %v812_v0, %v813_v39 }
  0x46   : > { %v929_v56 = vadd.f32 %v897_v58, %v770_v44  ;;  %v307_v55 = vmul.f32 %v1495_v9, %v1683_v22  ;;  %v375_v35 = vmul.f32 %v1497_v10, %v1745_v37  ;;  %v443_v32 = vmul.f32 %v1499_v11, %v1810_v43 }
  0x47   : > { %v1196_v40 = vadd.f32 %v1195_v20, %v1165_v51  ;;  %v635_v57 = vadd.f32 %v603_v41, %v474_v54  ;;  %v517_v24 = vrot.slane %v1810_v43, 1  ;;  %v518_v59 = vrot.slane %v1819_v47, 1 }
  0x48   : > { %v997_v63 = vadd.f32 %v965_v36, %v929_v56  ;;  %v966_v0 = vmul.f32 %v1570_v50, %v1759_v46  ;;  %v407_v2 = vadd.f32 %v375_v35, %v307_v55  ;;  %v604_v22 = vmul.f32 %v1509_v16, %v1710_v53 }
  0x49   : > { %v703_v48 = vadd.f32 %v671_v45, %v635_v57  ;;  %v1840_v3 = vsel %vm555_vm0, %v517_v24, %v518_v59  ;;  %v814_v4 = vrot.slane %v1810_v43, 2  ;;  %v815_v5 = vrot.slane %v1819_v47, 2 }
  0x4a   : > { %v1065_v6 = vadd.f32 %v1033_v60, %v997_v63  ;;  %v1034_v52 = vmul.f32 %v1597_v61, %v1824_v14  ;;  %v475_v7 = vadd.f32 %v443_v32, %v407_v2  ;;  %v672_v20 = vmul.f32 %v1511_v17, %v1775_v62 }
  0x4b   : > { %v771_v58 = vadd.f32 %v739_v21, %v703_v48  ;;  %v740_v53 = vmul.f32 %v1513_v18, %v1840_v3  ;;  %v899_v23 = vmul.f32 %v1568_v49, %v1732_v13  ;;  %v308_v28 = vmul.f32 %v1495_v9, %v1689_v30 }
  0x4c   : > { %1097 = vst [vmem:[%s1633_s30 + $0x30] sm:$0xff] %v1065_v6  ;;  %v1128_v12 = vadd.f32 %v1127_v33, %v1065_v6  ;;  %v1166_v25 = vmul.f32 %v1065_v6, %v1065_v6  ;;  %v636_v31 = vadd.f32 %v604_v22, %v475_v7  ;;  %v1858_v34 = vsel %vm850_vm1, %v814_v4, %v815_v5  ;;  %v1873_v33 = vld [vmem:[%s1493_s22 + $0xa8] sm:$0xff] }
  0x4d   : > { %v930_v36 = vadd.f32 %v898_v38, %v771_v58  ;;  %v376_v60 = vmul.f32 %v1497_v10, %v1754_v42  ;;  %v444_v39 = vmul.f32 %v1499_v11, %v1819_v47  ;;  %v519_v13 = vrot.slane %v259_v19, 1 }
  0x4e   : > { %v1197_v8 = vadd.f32 %v1196_v40, %v1166_v25  ;;  %v704_v30 = vadd.f32 %v672_v20, %v636_v31  ;;  %v967_v29 = vmul.f32 %v1570_v50, %v1789_v26  ;;  %v605_v41 = vmul.f32 %v1509_v16, %v1740_v15  ;;  %v1884_v40 = vld [vmem:[%s1493_s22 + $0xb0] sm:$0xff] }
  0x4f   : > { %v998_v44 = vadd.f32 %v966_v0, %v930_v36  ;;  %v408_v45 = vadd.f32 %v376_v60, %v308_v28  ;;  %v1870_v21 = vsel %vm555_vm0, %v518_v59, %v519_v13  ;;  %v816_v38 = vrot.slane %v259_v19, 2  ;;  %v262_v36 = vld [vmem:[%s1493_s22 + $0xb8] sm:$0xff] }
  0x50   : > { %v772_v51 = vadd.f32 %v740_v53, %v704_v30  ;;  %v1035_v54 = vmul.f32 %v1597_v61, %v1858_v34  ;;  %v673_v56 = vmul.f32 %v1511_v17, %v1805_v27  ;;  %v741_v15 = vmul.f32 %v1513_v18, %v1870_v21 }
  0x51   : > { %v1066_v55 = vadd.f32 %v1034_v52, %v998_v44  ;;  %v476_v35 = vadd.f32 %v444_v39, %v408_v45  ;;  %v900_v32 = vmul.f32 %v1568_v49, %v1759_v46  ;;  %v309_v57 = vmul.f32 %v1495_v9, %v1745_v37 }
  0x52   : > { %v931_v24 = vadd.f32 %v899_v23, %v772_v51  ;;  %v1890_v59 = vsel %vm850_vm1, %v815_v5, %v816_v38  ;;  %v377_v63 = vmul.f32 %v1497_v10, %v1810_v43  ;;  %v445_v0 = vmul.f32 %v1499_v11, %v1873_v33 }
  0x53   : > { %1098 = vst [vmem:[%s1633_s30 + $0x38] sm:$0xff] %v1066_v55  ;;  %v1129_v2 = vadd.f32 %v1128_v12, %v1066_v55  ;;  %v1167_v22 = vmul.f32 %v1066_v55, %v1066_v55  ;;  %v637_v46 = vadd.f32 %v605_v41, %v476_v35  ;;  %v520_v48 = vrot.slane %v1873_v33, 1 }
  0x54   : > { %v999_v4 = vadd.f32 %v967_v29, %v931_v24  ;;  %v409_v37 = vadd.f32 %v377_v63, %v309_v57  ;;  %v521_v6 = vrot.slane %v1884_v40, 1  ;;  %v606_v5 = vmul.f32 %v1509_v16, %v1775_v62 }
  0x55   : > { %v1198_v52 = vadd.f32 %v1197_v8, %v1167_v22  ;;  %v705_v7 = vadd.f32 %v673_v56, %v637_v46  ;;  %v674_v20 = vmul.f32 %v1511_v17, %v1840_v3  ;;  %v817_v19 = vrot.slane %v1873_v33, 2  ;;  %v1944_v22 = vld [vmem:[%s1493_s22 + $0xc0] sm:$0xff] }
  0x56   : > { %v1067_v58 = vadd.f32 %v1035_v54, %v999_v4  ;;  %v477_v53 = vadd.f32 %v445_v0, %v409_v37  ;;  %v1906_v23 = vsel %vm555_vm0, %v520_v48, %v521_v6  ;;  %v818_v28 = vrot.slane %v1884_v40, 2  ;;  %v1949_v48 = vld [vmem:[%s1493_s22 + $0xc8] sm:$0xff] }
  0x57   : > { %v773_v12 = vadd.f32 %v741_v15, %v705_v7  ;;  %v968_v25 = vmul.f32 %v1570_v50, %v1824_v14  ;;  %v1036_v62 = vmul.f32 %v1597_v61, %v1890_v59  ;;  %v742_v31 = vmul.f32 %v1513_v18, %v1906_v23 }
  0x58   : > { %1099 = vst [vmem:[%s1633_s30 + $0x40] sm:$0xff] %v1067_v58  ;;  %v1130_v60 = vadd.f32 %v1129_v2, %v1067_v58  ;;  %v1168_v39 = vmul.f32 %v1067_v58, %v1067_v58  ;;  %v638_v13 = vadd.f32 %v606_v5, %v477_v53  ;;  %v901_v8 = vmul.f32 %v1568_v49, %v1789_v26 }
  0x59   : > { %v932_v30 = vadd.f32 %v900_v32, %v773_v12  ;;  %v1921_v29 = vsel %vm850_vm1, %v817_v19, %v818_v28  ;;  %v310_v41 = vmul.f32 %v1495_v9, %v1754_v42  ;;  %v378_v44 = vmul.f32 %v1497_v10, %v1819_v47 }
  0x5a   : > { %v1199_v45 = vadd.f32 %v1198_v52, %v1168_v39  ;;  %v706_v38 = vadd.f32 %v674_v20, %v638_v13  ;;  %v446_v51 = vmul.f32 %v1499_v11, %v1884_v40  ;;  %v522_v54 = vrot.slane %v262_v36, 1 }
  0x5b   : > { %v1000_v26 = vadd.f32 %v968_v25, %v932_v30  ;;  %v969_v56 = vmul.f32 %v1570_v50, %v1858_v34  ;;  %v410_v15 = vadd.f32 %v378_v44, %v310_v41  ;;  %v607_v42 = vmul.f32 %v1509_v16, %v1805_v27 }
  0x5c   : > { %v774_v55 = vadd.f32 %v742_v31, %v706_v38  ;;  %v1037_v35 = vmul.f32 %v1597_v61, %v1921_v29  ;;  %v1937_v32 = vsel %vm555_vm0, %v521_v6, %v522_v54  ;;  %v819_v57 = vrot.slane %v262_v36, 2 }
  0x5d   : > { %v1068_v24 = vadd.f32 %v1036_v62, %v1000_v26  ;;  %v478_v63 = vadd.f32 %v446_v51, %v410_v15  ;;  %v675_v0 = vmul.f32 %v1511_v17, %v1870_v21  ;;  %v902_v2 = vmul.f32 %v1568_v49, %v1824_v14 }
  0x5e   : > { %v933_v27 = vadd.f32 %v901_v8, %v774_v55  ;;  %v743_v46 = vmul.f32 %v1513_v18, %v1937_v32  ;;  %v311_v4 = vmul.f32 %v1495_v9, %v1810_v43  ;;  %v379_v37 = vmul.f32 %v1497_v10, %v1873_v33 }
  0x5f   : > { %1100 = vst [vmem:[%s1633_s30 + $0x48] sm:$0xff] %v1068_v24  ;;  %v1131_v6 = vadd.f32 %v1130_v60, %v1068_v24  ;;  %v1169_v5 = vmul.f32 %v1068_v24, %v1068_v24  ;;  %v639_v52 = vadd.f32 %v607_v42, %v478_v63  ;;  %v1958_v14 = vsel %vm850_vm1, %v818_v28, %v819_v57 }
  0x60   : > { %v1001_v7 = vadd.f32 %v969_v56, %v933_v27  ;;  %v411_v20 = vadd.f32 %v379_v37, %v311_v4  ;;  %v447_v19 = vmul.f32 %v1499_v11, %v1944_v22  ;;  %v523_v58 = vrot.slane %v1944_v22, 1 }
  0x61   : > { %v1200_v43 = vadd.f32 %v1199_v45, %v1169_v5  ;;  %v707_v53 = vadd.f32 %v675_v0, %v639_v52  ;;  %v524_v12 = vrot.slane %v1949_v48, 1  ;;  %v608_v25 = vmul.f32 %v1509_v16, %v1840_v3  ;;  %v265_v45 = vld [vmem:[%s1493_s22 + $0xd0] sm:$0xff] }
  0x62   : > { %v1069_v62 = vadd.f32 %v1037_v35, %v1001_v7  ;;  %v479_v31 = vadd.f32 %v447_v19, %v411_v20  ;;  %v676_v28 = vmul.f32 %v1511_v17, %v1906_v23  ;;  %v820_v36 = vrot.slane %v1944_v22, 2 }
  0x63   : > { %v775_v60 = vadd.f32 %v743_v46, %v707_v53  ;;  %v970_v39 = vmul.f32 %v1570_v50, %v1890_v59  ;;  %v1973_v13 = vsel %vm555_vm0, %v523_v58, %v524_v12  ;;  %v821_v8 = vrot.slane %v1949_v48, 2 }
  0x64   : > { %1101 = vst [vmem:[%s1633_s30 + $0x50] sm:$0xff] %v1069_v62  ;;  %v1132_v30 = vadd.f32 %v1131_v6, %v1069_v62  ;;  %v1170_v3 = vmul.f32 %v1069_v62, %v1069_v62  ;;  %v640_v41 = vadd.f32 %v608_v25, %v479_v31  ;;  %v744_v44 = vmul.f32 %v1513_v18, %v1973_v13  ;;  %v2007_v6 = vld [vmem:[%s1493_s22 + $0xd8] sm:$0xff] }
  0x65   : > { %v934_v38 = vadd.f32 %v902_v2, %v775_v60  ;;  %v1038_v51 = vmul.f32 %v1597_v61, %v1958_v14  ;;  %v1984_v54 = vsel %vm850_vm1, %v820_v36, %v821_v8  ;;  %v312_v26 = vmul.f32 %v1495_v9, %v1819_v47 }
  0x66   : > { %v1201_v56 = vadd.f32 %v1200_v43, %v1170_v3  ;;  %v708_v15 = vadd.f32 %v676_v28, %v640_v41  ;;  %v903_v42 = vmul.f32 %v1568_v49, %v1858_v34  ;;  %v380_v55 = vmul.f32 %v1497_v10, %v1884_v40 }
  0x67   : > { %v1002_v35 = vadd.f32 %v970_v39, %v934_v38  ;;  %v971_v57 = vmul.f32 %v1570_v50, %v1921_v29  ;;  %v448_v24 = vmul.f32 %v1499_v11, %v1949_v48  ;;  %v525_v63 = vrot.slane %v265_v45, 1 }
  0x68   : > { %v776_v47 = vadd.f32 %v744_v44, %v708_v15  ;;  %v1039_v0 = vmul.f32 %v1597_v61, %v1984_v54  ;;  %v412_v2 = vadd.f32 %v380_v55, %v312_v26  ;;  %v609_v34 = vmul.f32 %v1509_v16, %v1870_v21  ;;  %v2014_v21 = vld [vmem:[%s1493_s22 + $0xe0] sm:$0xff]  ;;  %v268_v15 = vld [vmem:[%s1493_s22 + $0xe8] sm:$0xff] }
  0x69   : > { %v1070_v27 = vadd.f32 %v1038_v51, %v1002_v35  ;;  %v2002_v46 = vsel %vm555_vm0, %v524_v12, %v525_v63  ;;  %v677_v4 = vmul.f32 %v1511_v17, %v1937_v32  ;;  %v822_v37 = vrot.slane %v265_v45, 2 }
  0x6a   : > { %v935_v5 = vadd.f32 %v903_v42, %v776_v47  ;;  %v480_v52 = vadd.f32 %v448_v24, %v412_v2  ;;  %v904_v7 = vmul.f32 %v1568_v49, %v1890_v59  ;;  %v972_v20 = vmul.f32 %v1570_v50, %v1958_v14 }
  0x6b   : > { %1102 = vst [vmem:[%s1633_s30 + $0x58] sm:$0xff] %v1070_v27  ;;  %v1133_v19 = vadd.f32 %v1132_v30, %v1070_v27  ;;  %v1171_v58 = vmul.f32 %v1070_v27, %v1070_v27  ;;  %v745_v43 = vmul.f32 %v1513_v18, %v2002_v46  ;;  %v313_v53 = vmul.f32 %v1495_v9, %v1873_v33 }
  0x6c   : > { %v1003_v12 = vadd.f32 %v971_v57, %v935_v5  ;;  %v641_v25 = vadd.f32 %v609_v34, %v480_v52  ;;  %v381_v59 = vmul.f32 %v1497_v10, %v1944_v22  ;;  %v449_v62 = vmul.f32 %v1499_v11, %v2007_v6 }
  0x6d   : > { %v1202_v31 = vadd.f32 %v1201_v56, %v1171_v58  ;;  %v2027_v28 = vsel %vm850_vm1, %v821_v8, %v822_v37  ;;  %v526_v36 = vrot.slane %v2007_v6, 1  ;;  %v527_v60 = vrot.slane %v2014_v21, 1  ;;  %v2072_v58 = vld [vmem:[%s1493_s22 + $0xf0] sm:$0xff] }
  0x6e   : > { %v1071_v33 = vadd.f32 %v1039_v0, %v1003_v12  ;;  %v709_v39 = vadd.f32 %v677_v4, %v641_v25  ;;  %v413_v30 = vadd.f32 %v381_v59, %v313_v53  ;;  %v610_v3 = vmul.f32 %v1509_v16, %v1906_v23  ;;  %v2079_v25 = vld [vmem:[%s1493_s22 + $0xf8] sm:$0xff] }
  0x6f   : > { %v2035_v41 = vsel %vm555_vm0, %v526_v36, %v527_v60  ;;  %v678_v44 = vmul.f32 %v1511_v17, %v1973_v13  ;;  %v823_v8 = vrot.slane %v2007_v6, 2  ;;  %v824_v45 = vrot.slane %v2014_v21, 2 }
  0x70   : > { %1103 = vst [vmem:[%s1633_s30 + $0x60] sm:$0xff] %v1071_v33  ;;  %v1134_v38 = vadd.f32 %v1133_v19, %v1071_v33  ;;  %v1172_v51 = vmul.f32 %v1071_v33, %v1071_v33  ;;  %v777_v26 = vadd.f32 %v745_v43, %v709_v39  ;;  %v481_v56 = vadd.f32 %v449_v62, %v413_v30 }
  0x71   : > { %v1040_v23 = vmul.f32 %v1597_v61, %v2027_v28  ;;  %v2047_v42 = vsel %vm850_vm1, %v823_v8, %v824_v45  ;;  %v905_v55 = vmul.f32 %v1568_v49, %v1921_v29  ;;  %v314_v35 = vmul.f32 %v1495_v9, %v1884_v40 }
  0x72   : > { %v1203_v57 = vadd.f32 %v1202_v31, %v1172_v51  ;;  %v936_v24 = vadd.f32 %v904_v7, %v777_v26  ;;  %v642_v63 = vadd.f32 %v610_v3, %v481_v56  ;;  %v746_v47 = vmul.f32 %v1513_v18, %v2035_v41 }
  0x73   : > { %v973_v0 = vmul.f32 %v1570_v50, %v1984_v54  ;;  %v382_v2 = vmul.f32 %v1497_v10, %v1949_v48  ;;  %v450_v29 = vmul.f32 %v1499_v11, %v2014_v21  ;;  %v528_v34 = vrot.slane %v268_v15, 1 }
  0x74   : > { %v1004_v27 = vadd.f32 %v972_v20, %v936_v24  ;;  %v710_v40 = vadd.f32 %v678_v44, %v642_v63  ;;  %v1041_v4 = vmul.f32 %v1597_v61, %v2047_v42  ;;  %v825_v37 = vrot.slane %v268_v15, 2 }
  0x75   : > { %v414_v5 = vadd.f32 %v382_v2, %v314_v35  ;;  %v2065_v52 = vsel %vm555_vm0, %v527_v60, %v528_v34  ;;  %v611_v7 = vmul.f32 %v1509_v16, %v1937_v32  ;;  %v679_v19 = vmul.f32 %v1511_v17, %v2002_v46 }
  0x76   : > { %v1072_v20 = vadd.f32 %v1040_v23, %v1004_v27  ;;  %v778_v43 = vadd.f32 %v746_v47, %v710_v40  ;;  %v747_v53 = vmul.f32 %v1513_v18, %v2065_v52  ;;  %v906_v12 = vmul.f32 %v1568_v49, %v1958_v14  ;;  %v271_v47 = vld [vmem:[%s1493_s22 + $0x100] sm:$0xff] }
  0x77   : > { %v482_v59 = vadd.f32 %v450_v29, %v414_v5  ;;  %v2083_v62 = vsel %vm850_vm1, %v824_v45, %v825_v37  ;;  %v315_v32 = vmul.f32 %v1495_v9, %v1944_v22  ;;  %v383_v31 = vmul.f32 %v1497_v10, %v2007_v6 }
  0x78   : > { %1104 = vst [vmem:[%s1633_s30 + $0x68] sm:$0xff] %v1072_v20  ;;  %v1135_v36 = vadd.f32 %v1134_v38, %v1072_v20  ;;  %v1173_v60 = vmul.f32 %v1072_v20, %v1072_v20  ;;  %v937_v33 = vadd.f32 %v905_v55, %v778_v43  ;;  %v451_v14 = vmul.f32 %v1499_v11, %v2072_v58 }
  0x79   : > { %v643_v39 = vadd.f32 %v611_v7, %v482_v59  ;;  %v415_v30 = vadd.f32 %v383_v31, %v315_v32  ;;  %v529_v3 = vrot.slane %v2072_v58, 1  ;;  %v530_v44 = vrot.slane %v2079_v25, 1 }
  0x7a   : > { %v1204_v8 = vadd.f32 %v1203_v57, %v1173_v60  ;;  %v1005_v45 = vadd.f32 %v973_v0, %v937_v33  ;;  %v612_v22 = vmul.f32 %v1509_v16, %v1973_v13  ;;  %v680_v38 = vmul.f32 %v1511_v17, %v2035_v41  ;;  %v2137_v60 = vld [vmem:[%s1493_s22 + $0x108] sm:$0xff] }
  0x7b   : > { %v711_v51 = vadd.f32 %v679_v19, %v643_v39  ;;  %v483_v26 = vadd.f32 %v451_v14, %v415_v30  ;;  %v2100_v56 = vsel %vm555_vm0, %v529_v3, %v530_v44  ;;  %v826_v15 = vrot.slane %v2072_v58, 2  ;;  %v2144_v30 = vld [vmem:[%s1493_s22 + $0x110] sm:$0xff] }
  0x7c   : > { %v1073_v23 = vadd.f32 %v1041_v4, %v1005_v45  ;;  %v974_v55 = vmul.f32 %v1570_v50, %v2027_v28  ;;  %v1042_v35 = vmul.f32 %v1597_v61, %v2083_v62  ;;  %v827_v13 = vrot.slane %v2079_v25, 2 }
  0x7d   : > { %v779_v57 = vadd.f32 %v747_v53, %v711_v51  ;;  %v644_v24 = vadd.f32 %v612_v22, %v483_v26  ;;  %v748_v63 = vmul.f32 %v1513_v18, %v2100_v56  ;;  %v316_v0 = vmul.f32 %v1495_v9, %v1949_v48 }
  0x7e   : > { %1105 = vst [vmem:[%s1633_s30 + $0x70] sm:$0xff] %v1073_v23  ;;  %v1136_v2 = vadd.f32 %v1135_v36, %v1073_v23  ;;  %v1174_v29 = vmul.f32 %v1073_v23, %v1073_v23  ;;  %v2116_v34 = vsel %vm850_vm1, %v826_v15, %v827_v13  ;;  %v384_v27 = vmul.f32 %v1497_v10, %v2014_v21 }
  0x7f   : > { %v938_v40 = vadd.f32 %v906_v12, %v779_v57  ;;  %v712_v4 = vadd.f32 %v680_v38, %v644_v24  ;;  %v907_v37 = vmul.f32 %v1568_v49, %v1984_v54  ;;  %v452_v5 = vmul.f32 %v1499_v11, %v2079_v25 }
  0x80   : > { %v1205_v48 = vadd.f32 %v1204_v8, %v1174_v29  ;;  %v416_v7 = vadd.f32 %v384_v27, %v316_v0  ;;  %v531_v19 = vrot.slane %v271_v47, 1  ;;  %v613_v20 = vmul.f32 %v1509_v16, %v2002_v46 }
  0x81   : > { %v1006_v43 = vadd.f32 %v974_v55, %v938_v40  ;;  %v780_v53 = vadd.f32 %v748_v63, %v712_v4  ;;  %v975_v12 = vmul.f32 %v1570_v50, %v2047_v42  ;;  %v1043_v59 = vmul.f32 %v1597_v61, %v2116_v34 }
  0x82   : > { %v484_v54 = vadd.f32 %v452_v5, %v416_v7  ;;  %v2132_v32 = vsel %vm555_vm0, %v530_v44, %v531_v19  ;;  %v681_v31 = vmul.f32 %v1511_v17, %v2065_v52  ;;  %v828_v36 = vrot.slane %v271_v47, 2 }
  0x83   : > { %v1074_v46 = vadd.f32 %v1042_v35, %v1006_v43  ;;  %v939_v33 = vadd.f32 %v907_v37, %v780_v53  ;;  %v908_v14 = vmul.f32 %v1568_v49, %v2027_v28  ;;  %v976_v39 = vmul.f32 %v1570_v50, %v2083_v62 }
  0x84   : > { %v645_v3 = vadd.f32 %v613_v20, %v484_v54  ;;  %v749_v44 = vmul.f32 %v1513_v18, %v2132_v32  ;;  %v317_v8 = vmul.f32 %v1495_v9, %v2007_v6  ;;  %v385_v45 = vmul.f32 %v1497_v10, %v2072_v58 }
  0x85   : > { %1106 = vst [vmem:[%s1633_s30 + $0x78] sm:$0xff] %v1074_v46  ;;  %v1137_v22 = vadd.f32 %v1136_v2, %v1074_v46  ;;  %v1175_v38 = vmul.f32 %v1074_v46, %v1074_v46  ;;  %v1007_v28 = vadd.f32 %v975_v12, %v939_v33  ;;  %v453_v51 = vmul.f32 %v1499_v11, %v2137_v60 }
  0x86   : > { %v713_v26 = vadd.f32 %v681_v31, %v645_v3  ;;  %v417_v15 = vadd.f32 %v385_v45, %v317_v8  ;;  %v532_v23 = vrot.slane %v2137_v60, 1  ;;  %v533_v55 = vrot.slane %v2144_v30, 1 }
  0x87   : > { %v1206_v35 = vadd.f32 %v1205_v48, %v1175_v38  ;;  %v1075_v57 = vadd.f32 %v1043_v59, %v1007_v28  ;;  %v2159_v6 = vsel %vm850_vm1, %v827_v13, %v828_v36  ;;  %v614_v24 = vmul.f32 %v1509_v16, %v2035_v41  ;;  %v274_v48 = vld [vmem:[%s1493_s22 + $0x118] sm:$0xff]  ;;  %v2208_v38 = vld [vmem:[%s1493_s22 + $0x128] sm:$0xff] }
  0x88   : > { %v781_v63 = vadd.f32 %v749_v44, %v713_v26  ;;  %v485_v47 = vadd.f32 %v453_v51, %v417_v15  ;;  %v2165_v0 = vsel %vm555_vm0, %v532_v23, %v533_v55  ;;  %v682_v2 = vmul.f32 %v1511_v17, %v2100_v56 }
  0x89   : > { %1107 = vst [vmem:[%s1633_s30 + $0x80] sm:$0xff] %v1075_v57  ;;  %v1138_v29 = vadd.f32 %v1137_v22, %v1075_v57  ;;  %v1176_v27 = vmul.f32 %v1075_v57, %v1075_v57  ;;  %v829_v40 = vrot.slane %v2137_v60, 2  ;;  %v830_v13 = vrot.slane %v2144_v30, 2 }
  0x8a   : > { %v940_v4 = vadd.f32 %v908_v14, %v781_v63  ;;  %v1044_v41 = vmul.f32 %v1597_v61, %v2159_v6  ;;  %v646_v37 = vadd.f32 %v614_v24, %v485_v47  ;;  %v750_v5 = vmul.f32 %v1513_v18, %v2165_v0 }
  0x8b   : > { %v1207_v7 = vadd.f32 %v1206_v35, %v1176_v27  ;;  %v318_v19 = vmul.f32 %v1495_v9, %v2014_v21  ;;  %v386_v20 = vmul.f32 %v1497_v10, %v2079_v25  ;;  %v909_v12 = vmul.f32 %v1568_v49, %v2047_v42 }
  0x8c   : > { %v1008_v43 = vadd.f32 %v976_v39, %v940_v4  ;;  %v714_v53 = vadd.f32 %v682_v2, %v646_v37  ;;  %v454_v59 = vmul.f32 %v1499_v11, %v2144_v30  ;;  %v2187_v54 = vsel %vm850_vm1, %v829_v40, %v830_v13  ;;  %v2194_v39 = vld [vmem:[%s1493_s22 + $0x120] sm:$0xff] }
  0x8d   : > { %v418_v31 = vadd.f32 %v386_v20, %v318_v19  ;;  %v534_v36 = vrot.slane %v274_v48, 1  ;;  %v615_v21 = vmul.f32 %v1509_v16, %v2065_v52  ;;  %v977_v14 = vmul.f32 %v1570_v50, %v2116_v34  ;;  %v2241_v20 = vld [vmem:[%s2590_s1 + $0x8] ss:$0 sm:$0xff] }
  0x8e   : > { %v1076_v46 = vadd.f32 %v1044_v41, %v1008_v43  ;;  %v782_v33 = vadd.f32 %v750_v5, %v714_v53  ;;  %v683_v44 = vmul.f32 %v1511_v17, %v2132_v32  ;;  %v319_v8 = vmul.f32 %v1495_v9, %v2072_v58 }
  0x8f   : > { %v486_v42 = vadd.f32 %v454_v59, %v418_v31  ;;  %v2198_v3 = vsel %vm555_vm0, %v533_v55, %v534_v36  ;;  %v1045_v45 = vmul.f32 %v1597_v61, %v2187_v54  ;;  %v831_v22 = vrot.slane %v274_v48, 2  ;;  %v277_v48 = vld [vmem:[%s1493_s22 + $0x130] sm:$0xff] }
  0x90   : > { %1108 = vst [vmem:[%s1633_s30 + $0x88] sm:$0xff] %v1076_v46  ;;  %v941_v52 = vadd.f32 %v909_v12, %v782_v33  ;;  %v751_v51 = vmul.f32 %v1513_v18, %v2198_v3  ;;  %v387_v26 = vmul.f32 %v1497_v10, %v2137_v60  ;;  %v455_v15 = vmul.f32 %v1499_v11, %v2194_v39 }
  0x91   : > { %v647_v28 = vadd.f32 %v615_v21, %v486_v42  ;;  %v1177_v23 = vmul.f32 %v1076_v46, %v1076_v46  ;;  %v910_v55 = vmul.f32 %v1568_v49, %v2083_v62  ;;  %v535_v61 = vrot.slane %v2194_v39, 1 }
  0x92   : > { %v1009_v58 = vadd.f32 %v977_v14, %v941_v52  ;;  %v419_v57 = vadd.f32 %v387_v26, %v319_v8  ;;  %v536_v24 = vrot.slane %v2208_v38, 1  ;;  %v616_v63 = vmul.f32 %v1509_v16, %v2100_v56 }
  0x93   : > { %v715_v35 = vadd.f32 %v683_v44, %v647_v28  ;;  %v2224_v2 = vsel %vm850_vm1, %v830_v13, %v831_v22  ;;  %v978_v27 = vmul.f32 %v1570_v50, %v2159_v6  ;;  %v684_v41 = vmul.f32 %v1511_v17, %v2165_v0  ;;  %v2268_v22 = vld [vmem:[%s1493_s22 + $0x138] sm:$0xff] }
  0x94   : > { %v1077_v47 = vadd.f32 %v1045_v45, %v1009_v58  ;;  %v487_v62 = vadd.f32 %v455_v15, %v419_v57  ;;  %v2230_v4 = vsel %vm555_vm0, %v535_v61, %v536_v24  ;;  %v1139_v37 = vadd.f32 %v1138_v29, %v1076_v46  ;;  %v2273_v15 = vld [vmem:[%s1493_s22 + $0x140] sm:$0xff] }
  0x95   : > { %v783_v40 = vadd.f32 %v751_v51, %v715_v35  ;;  %v1208_v5 = vadd.f32 %v1207_v7, %v1177_v23  ;;  %v832_v56 = vrot.slane %v2194_v39, 2  ;;  %v833_v13 = vrot.slane %v2208_v38, 2 }
  0x96   : > { %1109 = vst [vmem:[%s1633_s30 + $0x90] sm:$0xff] %v1077_v47  ;;  %v1046_v43 = vmul.f32 %v2241_v20, %v2224_v2  ;;  %v648_v53 = vadd.f32 %v616_v63, %v487_v62  ;;  %v752_v29 = vmul.f32 %v1513_v18, %v2230_v4  ;;  %v911_v7 = vmul.f32 %v1568_v49, %v2116_v34 }
  0x97   : > { %v942_v19 = vadd.f32 %v910_v55, %v783_v40  ;;  %v320_v12 = vmul.f32 %v1495_v9, %v2079_v25  ;;  %v388_v59 = vmul.f32 %v1497_v10, %v2144_v30  ;;  %v456_v31 = vmul.f32 %v1499_v11, %v2208_v38 }
  0x98   : > { %v1178_v36 = vmul.f32 %v1077_v47, %v1077_v47  ;;  %v716_v46 = vadd.f32 %v684_v41, %v648_v53  ;;  %v537_v33 = vrot.slane %v277_v48, 1  ;;  %v2257_v14 = vsel %vm850_vm1, %v832_v56, %v833_v13 }
  0x99   : > { %v1010_v21 = vadd.f32 %v978_v27, %v942_v19  ;;  %v979_v34 = vmul.f32 %v1570_v50, %v2187_v54  ;;  %v420_v25 = vadd.f32 %v388_v59, %v320_v12  ;;  %v617_v42 = vmul.f32 %v1509_v16, %v2132_v32 }
  0x9a   : > { %v784_v8 = vadd.f32 %v752_v29, %v716_v46  ;;  %v2265_v52 = vsel %vm555_vm0, %v536_v24, %v537_v33  ;;  %v834_v45 = vrot.slane %v277_v48, 2  ;;  %v1140_v28 = vadd.f32 %v1139_v37, %v1077_v47 }
  0x9b   : > { %v1078_v44 = vadd.f32 %v1046_v43, %v1010_v21  ;;  %v488_v51 = vadd.f32 %v456_v31, %v420_v25  ;;  %v685_v26 = vmul.f32 %v1511_v17, %v2198_v3  ;;  %v321_v23 = vmul.f32 %v1495_v9, %v2137_v60 }
  0x9c   : > { %v1209_v32 = vadd.f32 %v1208_v5, %v1178_v36  ;;  %v943_v58 = vadd.f32 %v911_v7, %v784_v8  ;;  %v1047_v55 = vmul.f32 %v2241_v20, %v2257_v14  ;;  %v753_v61 = vmul.f32 %v1513_v18, %v2265_v52  ;;  %v280_v7 = vld [vmem:[%s1493_s22 + $0x148] sm:$0xff] }
  0x9d   : > { %1110 = vst [vmem:[%s1633_s30 + $0x98] sm:$0xff] %v1078_v44  ;;  %v649_v35 = vadd.f32 %v617_v42, %v488_v51  ;;  %v389_v57 = vmul.f32 %v1497_v10, %v2194_v39  ;;  %v457_v24 = vmul.f32 %v1499_v11, %v2268_v22  ;;  %v538_v63 = vrot.slane %v2268_v22, 1  ;;  %v2325_v51 = vld [vmem:[%s1493_s22 + $0x150] sm:$0xff] }
  0x9e   : > { %v1179_v47 = vmul.f32 %v1078_v44, %v1078_v44  ;;  %v1011_v60 = vadd.f32 %v979_v34, %v943_v58  ;;  %v2289_v27 = vsel %vm850_vm1, %v833_v13, %v834_v45  ;;  %v539_v40 = vrot.slane %v2273_v15, 1 }
  0x9f   : > { %v717_v62 = vadd.f32 %v685_v26, %v649_v35  ;;  %v912_v41 = vmul.f32 %v1568_v49, %v2159_v6  ;;  %v421_v37 = vadd.f32 %v389_v57, %v321_v23  ;;  %v618_v5 = vmul.f32 %v1509_v16, %v2165_v0  ;;  %v2338_v57 = vld [vmem:[%s1493_s22 + $0x158] sm:$0xff] }
  0xa0   : > { %v1141_v56 = vadd.f32 %v1140_v28, %v1078_v44  ;;  %v1079_v48 = vadd.f32 %v1047_v55, %v1011_v60  ;;  %v980_v19 = vmul.f32 %v1570_v50, %v2224_v2  ;;  %v2300_v13 = vsel %vm555_vm0, %v538_v63, %v539_v40 }
  0xa1   : > { %v785_v43 = vadd.f32 %v753_v61, %v717_v62  ;;  %v1048_v53 = vmul.f32 %v2241_v20, %v2289_v27  ;;  %v489_v29 = vadd.f32 %v457_v24, %v421_v37  ;;  %v686_v6 = vmul.f32 %v1511_v17, %v2230_v4 }
  0xa2   : > { %v1210_v12 = vadd.f32 %v1209_v32, %v1179_v47  ;;  %1111 = vst [vmem:[%s1633_s30 + $0xa0] sm:$0xff] %v1079_v48  ;;  %v835_v0 = vrot.slane %v2268_v22, 2  ;;  %v836_v59 = vrot.slane %v2273_v15, 2  ;;  %v322_v31 = vmul.f32 %v1495_v9, %v2144_v30 }
  0xa3   : > { %v944_v36 = vadd.f32 %v912_v41, %v785_v43  ;;  %v650_v21 = vadd.f32 %v618_v5, %v489_v29  ;;  %v754_v46 = vmul.f32 %v1513_v18, %v2300_v13  ;;  %v390_v33 = vmul.f32 %v1497_v10, %v2208_v38 }
  0xa4   : > { %v913_v34 = vmul.f32 %v1568_v49, %v2187_v54  ;;  %v981_v25 = vmul.f32 %v1570_v50, %v2257_v14  ;;  %v458_v42 = vmul.f32 %v1499_v11, %v2273_v15  ;;  %v540_v44 = vrot.slane %v280_v7, 1 }
  0xa5   : > { %v1012_v30 = vadd.f32 %v980_v19, %v944_v36  ;;  %v718_v8 = vadd.f32 %v686_v6, %v650_v21  ;;  %v422_v45 = vadd.f32 %v390_v33, %v322_v31  ;;  %v619_v28 = vmul.f32 %v1509_v16, %v2198_v3 }
  0xa6   : > { %v1142_v26 = vadd.f32 %v1141_v56, %v1079_v48  ;;  %v1180_v23 = vmul.f32 %v1079_v48, %v1079_v48  ;;  %v2329_v54 = vsel %vm850_vm1, %v835_v0, %v836_v59  ;;  %v2333_v32 = vsel %vm555_vm0, %v539_v40, %v540_v44 }
  0xa7   : > { %v1080_v58 = vadd.f32 %v1048_v53, %v1012_v30  ;;  %v786_v55 = vadd.f32 %v754_v46, %v718_v8  ;;  %v490_v61 = vadd.f32 %v458_v42, %v422_v45  ;;  %v687_v35 = vmul.f32 %v1511_v17, %v2265_v52 }
  0xa8   : > { %v837_v3 = vrot.slane %v280_v7, 2  ;;  %v323_v24 = vmul.f32 %v1495_v9, %v2194_v39  ;;  %v391_v63 = vmul.f32 %v1497_v10, %v2268_v22  ;;  %v459_v47 = vmul.f32 %v1499_v11, %v2325_v51 }
  0xa9   : > { %1112 = vst [vmem:[%s1633_s30 + $0xa8] sm:$0xff] %v1080_v58  ;;  %v945_v60 = vadd.f32 %v913_v34, %v786_v55  ;;  %v1049_v40 = vmul.f32 %v2241_v20, %v2329_v54  ;;  %v651_v62 = vadd.f32 %v619_v28, %v490_v61  ;;  %v755_v41 = vmul.f32 %v1513_v18, %v2333_v32 }
  0xaa   : > { %v914_v37 = vmul.f32 %v1568_v49, %v2224_v2  ;;  %v423_v5 = vadd.f32 %v391_v63, %v323_v24  ;;  %v541_v39 = vrot.slane %v2325_v51, 1  ;;  %v542_v56 = vrot.slane %v2338_v57, 1 }
  0xab   : > { %v1013_v48 = vadd.f32 %v981_v25, %v945_v60  ;;  %v719_v19 = vadd.f32 %v687_v35, %v651_v62  ;;  %v982_v43 = vmul.f32 %v1570_v50, %v2289_v27  ;;  %v620_v53 = vmul.f32 %v1509_v16, %v2230_v4 }
  0xac   : > { %v2361_v29 = vsel %vm850_vm1, %v836_v59, %v837_v3  ;;  %v491_v2 = vadd.f32 %v459_v47, %v423_v5  ;;  %v2365_v6 = vsel %vm555_vm0, %v541_v39, %v542_v56  ;;  %v688_v7 = vmul.f32 %v1511_v17, %v2300_v13  ;;  %v283_v59 = vld [vmem:[%s1493_s22 + $0x160] sm:$0xff] }
  0xad   : > { %v1081_v0 = vadd.f32 %v1049_v40, %v1013_v48  ;;  %v787_v31 = vadd.f32 %v755_v41, %v719_v19  ;;  %v838_v36 = vrot.slane %v2325_v51, 2  ;;  %v839_v21 = vrot.slane %v2338_v57, 2 }
  0xae   : > { %v652_v46 = vadd.f32 %v620_v53, %v491_v2  ;;  %v756_v4 = vmul.f32 %v1513_v18, %v2365_v6  ;;  %v324_v33 = vmul.f32 %v1495_v9, %v2208_v38  ;;  %v1211_v34 = vadd.f32 %v1210_v12, %v1180_v23 }
  0xaf   : > { %v1181_v25 = vmul.f32 %v1080_v58, %v1080_v58  ;;  %1113 = vst [vmem:[%s1633_s30 + $0xb0] sm:$0xff] %v1081_v0  ;;  %v946_v42 = vadd.f32 %v914_v37, %v787_v31  ;;  %v1050_v44 = vmul.f32 %v2241_v20, %v2361_v29  ;;  %v915_v8 = vmul.f32 %v1568_v49, %v2257_v14  ;;  %v2405_v37 = vld [vmem:[%s1493_s22 + $0x170] sm:$0xff] }
  0xb0   : > { %v720_v30 = vadd.f32 %v688_v7, %v652_v46  ;;  %v392_v45 = vmul.f32 %v1497_v10, %v2273_v15  ;;  %v460_v28 = vmul.f32 %v1499_v11, %v2338_v57  ;;  %v1143_v55 = vadd.f32 %v1142_v26, %v1080_v58  ;;  %v2398_v58 = vld [vmem:[%s1493_s22 + $0x168] sm:$0xff] }
  0xb1   : > { %v1014_v38 = vadd.f32 %v982_v43, %v946_v42  ;;  %v2387_v12 = vsel %vm850_vm1, %v838_v36, %v839_v21  ;;  %v543_v23 = vrot.slane %v283_v59, 1  ;;  %v983_v35 = vmul.f32 %v1570_v50, %v2329_v54 }
  0xb2   : > { %v788_v61 = vadd.f32 %v756_v4, %v720_v30  ;;  %v424_v14 = vadd.f32 %v392_v45, %v324_v33  ;;  %v621_v3 = vmul.f32 %v1509_v16, %v2265_v52  ;;  %v1212_v24 = vadd.f32 %v1211_v34, %v1181_v25 }
  0xb3   : > { %v1182_v63 = vmul.f32 %v1081_v0, %v1081_v0  ;;  %v1082_v47 = vadd.f32 %v1050_v44, %v1014_v38  ;;  %v2395_v26 = vsel %vm555_vm0, %v542_v56, %v543_v23  ;;  %v1051_v40 = vmul.f32 %v2241_v20, %v2387_v12 }
  0xb4   : > { %v947_v60 = vadd.f32 %v915_v8, %v788_v61  ;;  %v492_v62 = vadd.f32 %v460_v28, %v424_v14  ;;  %v689_v41 = vmul.f32 %v1511_v17, %v2333_v32  ;;  %v1144_v52 = vadd.f32 %v1143_v55, %v1081_v0 }
  0xb5   : > { %1114 = vst [vmem:[%s1633_s30 + $0xb8] sm:$0xff] %v1082_v47  ;;  %v757_v5 = vmul.f32 %v1513_v18, %v2395_v26  ;;  %v840_v39 = vrot.slane %v283_v59, 2  ;;  %v325_v56 = vmul.f32 %v1495_v9, %v2268_v22  ;;  %v393_v43 = vmul.f32 %v1497_v10, %v2325_v51 }
  0xb6   : > { %v1015_v48 = vadd.f32 %v983_v35, %v947_v60  ;;  %v653_v19 = vadd.f32 %v621_v3, %v492_v62  ;;  %v461_v53 = vmul.f32 %v1499_v11, %v2398_v58  ;;  %v1213_v2 = vadd.f32 %v1212_v24, %v1182_v63 }
  0xb7   : > { %v916_v7 = vmul.f32 %v1568_v49, %v2289_v27  ;;  %v544_v0 = vrot.slane %v2398_v58, 1  ;;  %v545_v31 = vrot.slane %v2405_v37, 1  ;;  %v425_v46 = vadd.f32 %v393_v43, %v325_v56  ;;  %v2466_v43 = vld [vmem:[%s1493_s22 + $0x188] sm:$0xff] }
  0xb8   : > { %v1083_v36 = vadd.f32 %v1051_v40, %v1015_v48  ;;  %v721_v22 = vadd.f32 %v689_v41, %v653_v19  ;;  %v622_v4 = vmul.f32 %v1509_v16, %v2300_v13  ;;  %v1183_v59 = vmul.f32 %v1082_v47, %v1082_v47  ;;  %v286_v13 = vld [vmem:[%s1493_s22 + $0x178] sm:$0xff] }
  0xb9   : > { %v2424_v33 = vsel %vm850_vm1, %v839_v21, %v840_v39  ;;  %v984_v34 = vmul.f32 %v1570_v50, %v2361_v29  ;;  %v2430_v27 = vsel %vm555_vm0, %v544_v0, %v545_v31  ;;  %v1145_v25 = vadd.f32 %v1144_v52, %v1082_v47 }
  0xba   : > { %1115 = vst [vmem:[%s1633_s30 + $0xc0] sm:$0xff] %v1083_v36  ;;  %v789_v42 = vadd.f32 %v757_v5, %v721_v22  ;;  %v493_v44 = vadd.f32 %v461_v53, %v425_v46  ;;  %v690_v30 = vmul.f32 %v1511_v17, %v2365_v6  ;;  %v841_v8 = vrot.slane %v2398_v58, 2 }
  0xbb   : > { %v842_v21 = vrot.slane %v2405_v37, 2  ;;  %v326_v45 = vmul.f32 %v1495_v9, %v2273_v15  ;;  %v1052_v55 = vmul.f32 %v2241_v20, %v2424_v33  ;;  %v758_v23 = vmul.f32 %v1513_v18, %v2430_v27 }
  0xbc   : > { %v948_v28 = vadd.f32 %v916_v7, %v789_v42  ;;  %v654_v38 = vadd.f32 %v622_v4, %v493_v44  ;;  %v1214_v61 = vadd.f32 %v1213_v2, %v1183_v59  ;;  %v394_v35 = vmul.f32 %v1497_v10, %v2338_v57 }
  0xbd   : > { %v462_v14 = vmul.f32 %v1499_v11, %v2405_v37  ;;  %v546_v3 = vrot.slane %v286_v13, 1  ;;  %v1146_v24 = vadd.f32 %v1145_v25, %v1083_v36  ;;  %v917_v47 = vmul.f32 %v1568_v49, %v2329_v54  ;;  %v287_v54 = vld [vmem:[%s1493_s22 + $0x180] sm:$0xff] }
  0xbe   : > { %v1016_v15 = vadd.f32 %v984_v34, %v948_v28  ;;  %v722_v63 = vadd.f32 %v690_v30, %v654_v38  ;;  %v2452_v60 = vsel %vm850_vm1, %v841_v8, %v842_v21  ;;  %v985_v40 = vmul.f32 %v1570_v50, %v2387_v12 }
  0xbf   : > { %v426_v62 = vadd.f32 %v394_v35, %v326_v45  ;;  %v623_v41 = vmul.f32 %v1509_v16, %v2333_v32  ;;  %v2460_v39 = vsel %vm555_vm0, %v545_v31, %v546_v3  ;;  %v843_v56 = vrot.slane %v286_v13, 2  ;;  %v289_v35 = vld [vmem:[%s1493_s22 + $0x190] sm:$0xff] }
  0xc0   : > { %v1084_v52 = vadd.f32 %v1052_v55, %v1016_v15  ;;  %v790_v5 = vadd.f32 %v758_v23, %v722_v63  ;;  %v691_v19 = vmul.f32 %v1511_v17, %v2395_v26  ;;  %v327_v53 = vmul.f32 %v1495_v9, %v2325_v51 }
  0xc1   : > { %v494_v48 = vadd.f32 %v462_v14, %v426_v62  ;;  %v395_v32 = vmul.f32 %v1497_v10, %v2398_v58  ;;  %v1184_v2 = vmul.f32 %v1083_v36, %v1083_v36  ;;  %v1053_v0 = vmul.f32 %v2241_v20, %v2452_v60 }
  0xc2   : > { %1116 = vst [vmem:[%s1633_s30 + $0xc8] sm:$0xff] %v1084_v52  ;;  %v949_v7 = vadd.f32 %v917_v47, %v790_v5  ;;  %v918_v31 = vmul.f32 %v1568_v49, %v2361_v29  ;;  %v759_v46 = vmul.f32 %v1513_v18, %v2460_v39  ;;  %v463_v59 = vmul.f32 %v1499_v11, %v287_v54 }
  0xc3   : > { %v655_v22 = vadd.f32 %v623_v41, %v494_v48  ;;  %v427_v4 = vadd.f32 %v395_v32, %v327_v53  ;;  %v2482_v36 = vsel %vm850_vm1, %v842_v21, %v843_v56  ;;  %v547_v34 = vrot.slane %v287_v54, 1  ;;  %v290_v53 = vld [vmem:[%s1493_s22 + $0x198] sm:$0xff] }
  0xc4   : > { %v1017_v51 = vadd.f32 %v985_v40, %v949_v7  ;;  %v548_v25 = vrot.slane %v2466_v43, 1  ;;  %v624_v29 = vmul.f32 %v1509_v16, %v2365_v6  ;;  %v692_v30 = vmul.f32 %v1511_v17, %v2430_v27 }
  0xc5   : > { %v723_v42 = vadd.f32 %v691_v19, %v655_v22  ;;  %v495_v44 = vadd.f32 %v463_v59, %v427_v4  ;;  %v844_v45 = vrot.slane %v287_v54, 2  ;;  %v845_v21 = vrot.slane %v2466_v43, 2  ;;  %v2526_v4 = vld [vmem:[%s1493_s22 + $0x1a0] sm:$0xff] }
  0xc6   : > { %v1085_v13 = vadd.f32 %v1053_v0, %v1017_v51  ;;  %v559_v8 = vsel %vm555_vm0, %v547_v34, %v548_v25  ;;  %v986_v55 = vmul.f32 %v1570_v50, %v2424_v33  ;;  %v1215_v14 = vadd.f32 %v1214_v61, %v1184_v2 }
  0xc7   : > { %v791_v28 = vadd.f32 %v759_v46, %v723_v42  ;;  %v656_v38 = vadd.f32 %v624_v29, %v495_v44  ;;  %v760_v23 = vmul.f32 %v1513_v18, %v559_v8  ;;  %v1147_v6 = vadd.f32 %v1146_v24, %v1084_v52 }
  0xc8   : > { %1117 = vst [vmem:[%s1633_s30 + $0xd0] sm:$0xff] %v1085_v13  ;;  %v1054_v3 = vmul.f32 %v2241_v20, %v2482_v36  ;;  %v919_v15 = vmul.f32 %v1568_v49, %v2387_v12  ;;  %v2503_v40 = vsel %vm850_vm1, %v844_v45, %v845_v21  ;;  %v328_v62 = vmul.f32 %v1495_v9, %v2338_v57 }
  0xc9   : > { %v950_v63 = vadd.f32 %v918_v31, %v791_v28  ;;  %v724_v47 = vadd.f32 %v692_v30, %v656_v38  ;;  %v1185_v41 = vmul.f32 %v1084_v52, %v1084_v52  ;;  %v396_v61 = vmul.f32 %v1497_v10, %v2405_v37 }
  0xca   : > { %v464_v24 = vmul.f32 %v1499_v11, %v2466_v43  ;;  %v549_v5 = vrot.slane %v289_v35, 1  ;;  %v397_v12 = vmul.f32 %v1497_v10, %v287_v54  ;;  %v987_v19 = vmul.f32 %v1570_v50, %v2452_v60 }
  0xcb   : > { %v1018_v56 = vadd.f32 %v986_v55, %v950_v63  ;;  %v792_v48 = vadd.f32 %v760_v23, %v724_v47  ;;  %v398_v57 = vmul.f32 %v1497_v10, %v2466_v43  ;;  %v1055_v52 = vmul.f32 %v2241_v20, %v2503_v40 }
  0xcc   : > { %v428_v32 = vadd.f32 %v396_v61, %v328_v62  ;;  %v625_v2 = vmul.f32 %v1509_v16, %v2395_v26  ;;  %v558_v54 = vsel %vm555_vm0, %v548_v25, %v549_v5  ;;  %v693_v31 = vmul.f32 %v1511_v17, %v2460_v39 }
  0xcd   : > { %v1086_v7 = vadd.f32 %v1054_v3, %v1018_v56  ;;  %v951_v0 = vadd.f32 %v919_v15, %v792_v48  ;;  %v846_v46 = vrot.slane %v289_v35, 2  ;;  %v329_v10 = vmul.f32 %v1495_v9, %v2398_v58  ;;  %v292_v3 = vld [vmem:[%s1493_s22 + $0x1a8] sm:$0xff] }
  0xce   : > { %v496_v22 = vadd.f32 %v464_v24, %v428_v32  ;;  %v465_v43 = vmul.f32 %v1499_v11, %v290_v53  ;;  %v1216_v59 = vadd.f32 %v1215_v14, %v1185_v41  ;;  %v1148_v51 = vadd.f32 %v1147_v6, %v1085_v13 }
  0xcf   : > { %v1186_v26 = vmul.f32 %v1085_v13, %v1085_v13  ;;  %1118 = vst [vmem:[%s1633_s30 + $0xd8] sm:$0xff] %v1086_v7  ;;  %v1019_v34 = vadd.f32 %v987_v19, %v951_v0  ;;  %v761_v25 = vmul.f32 %v1513_v18, %v558_v54  ;;  %v429_v44 = vadd.f32 %v397_v12, %v329_v10 }
  0xd0   : > { %v657_v42 = vadd.f32 %v625_v2, %v496_v22  ;;  %v550_v29 = vrot.slane %v290_v53, 1  ;;  %v920_v45 = vmul.f32 %v1568_v49, %v2424_v33  ;;  %v551_v58 = vrot.slane %v2526_v4, 1 }
  0xd1   : > { %v1087_v30 = vadd.f32 %v1055_v52, %v1019_v34  ;;  %v626_v28 = vmul.f32 %v1509_v16, %v2430_v27  ;;  %v853_v13 = vsel %vm850_vm1, %v845_v21, %v846_v46  ;;  %v497_v38 = vadd.f32 %v465_v43, %v429_v44 }
  0xd2   : > { %v725_v55 = vadd.f32 %v693_v31, %v657_v42  ;;  %v694_v23 = vmul.f32 %v1511_v17, %v559_v8  ;;  %v1217_v35 = vadd.f32 %v1216_v59, %v1186_v26  ;;  %v557_v14 = vsel %vm555_vm0, %v550_v29, %v551_v58 }
  0xd3   : > { %1119 = vst [vmem:[%s1633_s30 + $0xe0] sm:$0xff] %v1087_v30  ;;  %v847_v6 = vrot.slane %v290_v53, 2  ;;  %v848_v33 = vrot.slane %v2526_v4, 2  ;;  %v988_v27 = vmul.f32 %v1570_v50, %v2482_v36  ;;  %v658_v63 = vadd.f32 %v626_v28, %v497_v38 }
  0xd4   : > { %v793_v15 = vadd.f32 %v761_v25, %v725_v55  ;;  %v762_v47 = vmul.f32 %v1513_v18, %v557_v14  ;;  %v1187_v21 = vmul.f32 %v1086_v7, %v1086_v7  ;;  %v1056_v62 = vmul.f32 %v2241_v20, %v853_v13 }
  0xd5   : > { %v466_v8 = vmul.f32 %v1499_v11, %v2526_v4  ;;  %v330_v41 = vmul.f32 %v1495_v9, %v2405_v37  ;;  %v726_v24 = vadd.f32 %v694_v23, %v658_v63  ;;  %v921_v5 = vmul.f32 %v1568_v49, %v2452_v60 }
  0xd6   : > { %v952_v61 = vadd.f32 %v920_v45, %v793_v15  ;;  %v552_v56 = vrot.slane %v292_v3, 1  ;;  %v1149_v12 = vadd.f32 %v1148_v51, %v1086_v7  ;;  %v852_v48 = vsel %vm850_vm1, %v847_v6, %v848_v33 }
  0xd7   : > { %v430_v19 = vadd.f32 %v398_v57, %v330_v41  ;;  %v627_v53 = vmul.f32 %v1509_v16, %v2460_v39  ;;  %v794_v11 = vadd.f32 %v762_v47, %v726_v24  ;;  %v989_v9 = vmul.f32 %v1570_v50, %v2503_v40 }
  0xd8   : > { %v1020_v52 = vadd.f32 %v988_v27, %v952_v61  ;;  %v556_v37 = vsel %vm555_vm0, %v551_v58, %v552_v56  ;;  %v1218_v32 = vadd.f32 %v1217_v35, %v1187_v21  ;;  %v1188_v60 = vmul.f32 %v1087_v30, %v1087_v30 }
  0xd9   : > { %v498_v2 = vadd.f32 %v466_v8, %v430_v19  ;;  %v695_v7 = vmul.f32 %v1511_v17, %v558_v54  ;;  %v953_v31 = vadd.f32 %v921_v5, %v794_v11  ;;  %v1057_v57 = vmul.f32 %v2241_v20, %v852_v48 }
  0xda   : > { %v1088_v0 = vadd.f32 %v1056_v62, %v1020_v52  ;;  %v849_v16 = vrot.slane %v292_v3, 2  ;;  %v1150_v39 = vadd.f32 %v1149_v12, %v1087_v30  ;;  %v763_v46 = vmul.f32 %v1513_v18, %v556_v37 }
  0xdb   : > { %v659_v22 = vadd.f32 %v627_v53, %v498_v2  ;;  %v1021_v40 = vadd.f32 %v989_v9, %v953_v31  ;;  %v1219_v4 = vadd.f32 %v1218_v32, %v1188_v60  ;;  %v922_v59 = vmul.f32 %v1568_v49, %v2482_v36 }
  0xdc   : > { %1120 = vst [vmem:[%s1633_s30 + $0xe8] sm:$0xff] %v1088_v0  ;;  %v1189_v10 = vmul.f32 %v1088_v0, %v1088_v0  ;;  %v851_v54 = vsel %vm850_vm1, %v848_v33, %v849_v16  ;;  %v1151_v51 = vadd.f32 %v1150_v39, %v1088_v0  ;;  %v990_v34 = vmul.f32 %v1570_v50, %v853_v13 }
  0xdd   : > { %v727_v43 = vadd.f32 %v695_v7, %v659_v22  ;;  %v1089_v17 = vadd.f32 %v1057_v57, %v1021_v40  ;;  %v1058_v44 = vmul.f32 %v2241_v20, %v851_v54 }
  0xde   : > { %v1220_v42 = vadd.f32 %v1219_v4, %v1189_v10 }
  0xdf   : > { %v795_v26 = vadd.f32 %v763_v46, %v727_v43  ;;  %1121 = vst [vmem:[%s1633_s30 + $0xf0] sm:$0xff] %v1089_v17  ;;  %v1190_v18 = vmul.f32 %v1089_v17, %v1089_v17  ;;  %v1152_v29 = vadd.f32 %v1151_v51, %v1089_v17 }
  0xe1   : > { %v954_v25 = vadd.f32 %v922_v59, %v795_v26  ;;  %v1221_v45 = vadd.f32 %v1220_v42, %v1190_v18 }
  0xe3   : > { %v1022_v30 = vadd.f32 %v990_v34, %v954_v25 }
  0xe5   : > { %v1090_v58 = vadd.f32 %v1058_v44, %v1022_v30 }
  0xe7   : > { %1122 = vst [vmem:[%s1633_s30 + $0xf8] sm:$0xff] %v1090_v58  ;;  %v1153_v49 = vadd.f32 %v1152_v29, %v1090_v58  ;;  %v1191_v36 = vmul.f32 %v1090_v58, %v1090_v58 }
  0xe9   : > { %v1154_v1 = vrot.slane %v1153_v49, 4  ;;  %v1222_v28 = vadd.f32 %v1221_v45, %v1191_v36 }
  0xeb   : > { %v1155_v55 = vadd.f32 %v1154_v1, %v1153_v49  ;;  %v1223_v38 = vrot.slane %v1222_v28, 4 }
  0xed   : > { %v1156_v23 = vrot.slane %v1155_v55, 2  ;;  %v1224_v50 = vadd.f32 %v1223_v38, %v1222_v28 }
  0xef   : > { %v1157_v13 = vadd.f32 %v1156_v23, %v1155_v55  ;;  %v1225_v35 = vrot.slane %v1224_v50, 2 }
  0xf1   : > { %v1158_v14 = vrot.slane %v1157_v13, 1  ;;  %v1226_v6 = vadd.f32 %v1225_v35, %v1224_v50 }
  0xf3   : > { %v1159_v20 = vadd.f32 %v1158_v14, %v1157_v13  ;;  %v1227_v33 = vrot.slane %v1226_v6, 1 }
  0xf5   : > { %v1228_v3 = vadd.f32 %v1227_v33, %v1226_v6 }
  0xf7   : > { %v1230_v15 = vsel %vm1229_vm2, %v1159_v20, %v1228_v3 }
  0xf8   : > { %1231 = vst [vmem:[%s238_s9] sm:$0x3] %v1230_v15 }
  0xf9 PF: > { %s14_s14 = sadd.s32 1, %s1430_s14   ;;  %s2594_s12 = smov %s1426_s13 }
  0xfa   : > { %p11_p6 = scmp.ge.s32.totalorder %s14_s14, 4   ;;  %s2595_s13 = smov %s2597_s15 }
  0xfc   :  { %13 = sbr.rel (!%p11_p6) target bundleno = 2 (0x2), region = 73 }

</bundles_post_ra>
